<compile_context>
chip_gen: v7x
topology: tpu7x:2x2x1
jax: 0.10.0
libtpu: 0.0.40
codegen_flags: <defaults>
</compile_context>

<pallas_src>
import functools

import numpy as np
import jax
import jax.numpy as jnp
from jax import lax
from jax.experimental import pallas as pl
from jax.experimental.pallas import tpu as pltpu


def _cdiv(a, b):
    return (a + b - 1) // b


def _round_up(x, m):
    return _cdiv(x, m) * m


# ---------------------------------------------------------------------------
# Pallas kernel: fused windowed-DFT matmul -> magnitudes -> partial sums
# ---------------------------------------------------------------------------
def _stft_loss_kernel(xyf_ref, basis_ref, out_ref, *, tm, f_pad):
    i = pl.program_id(1)            # frame-tile reduction step

    @pl.when(i == 0)
    def _init():
        out_ref[...] = jnp.zeros_like(out_ref)

    # Single fused MXU matmul: [x|y] frame tile (rows) x [cos|sin] basis (cols).
    ri = jnp.dot(xyf_ref[...], basis_ref[...],
                 preferred_element_type=jnp.float32)        # (2*tm, 2*f_pad)

    sq = ri * ri
    power = sq[:, :f_pad] + sq[:, f_pad:]                    # re^2 + im^2, (2*tm, f_pad)
    p_cl = jnp.maximum(power, 1e-7)
    mag = jnp.sqrt(p_cl)
    x_mag = mag[:tm]
    y_mag = mag[tm:]

    # Padded rows / padded freq lanes are EXACTLY zero before the clamp, so they
    # contribute 0 to s_diff and s_log; the constant 1e-7 leakage into s_ref is
    # subtracted outside the kernel (no per-step masking needed).
    diff = y_mag - x_mag
    s_diff = jnp.sum(diff * diff)                            # ||y - x||_F^2
    s_ref = jnp.sum(p_cl[tm:])                               # ||y||_F^2 (+ const leakage)
    s_log = jnp.sum(jnp.abs(jnp.log(y_mag) - jnp.log(x_mag)))

    # Pack the three partial sums into a lane-dense (1, 8, 128) block and accumulate.
    lane = lax.broadcasted_iota(jnp.int32, (1, 8, 128), 2)
    out_ref[...] += (jnp.where(lane == 0, s_diff, 0.0)
                     + jnp.where(lane == 1, s_ref, 0.0)
                     + jnp.where(lane == 2, s_log, 0.0))


def _stft_loss_sums(xyf, basis, *, tm, n_parallel, inner_tiles, f_pad):
    """Returns raw (||y-x||_F^2, ||y||_F^2 + leakage, sum |log y - log x|)."""
    n_fft, two_f_pad = basis.shape
    itemsize = jnp.dtype(xyf.dtype).itemsize

    # VMEM budget: single-buffered basis + double-buffered interleaved frame tiles
    # + f32 intermediates, plus headroom.
    vmem_bytes = (n_fft * two_f_pad * itemsize
                  + 2 * (2 * tm) * n_fft * itemsize
                  + 6 * (2 * tm) * two_f_pad * 4
                  + (2 << 20))

    kernel = functools.partial(_stft_loss_kernel, tm=tm, f_pad=f_pad)

    out = pl.pallas_call(
        kernel,
        out_shape=jax.ShapeDtypeStruct((n_parallel, 8, 128), jnp.float32),
        grid=(n_parallel, inner_tiles),
        in_specs=[
            pl.BlockSpec((2 * tm, n_fft), lambda p, i: (p * inner_tiles + i, 0)),
            # Constant index_map -> DFT basis is DMA'd once and kept single-buffered.
            pl.BlockSpec((n_fft, two_f_pad), lambda p, i: (0, 0),
                         pipeline_mode=pl.Buffered(1)),
        ],
        out_specs=pl.BlockSpec((1, 8, 128), lambda p, i: (p, 0, 0)),
        compiler_params=pltpu.CompilerParams(
            dimension_semantics=("parallel", "arbitrary"),
            vmem_limit_bytes=max(vmem_bytes, 32 * 1024 * 1024)),
    )(xyf, basis)

    sums = jnp.sum(out, axis=0)[0]      # (128,) — lanes 0..2 hold the three sums
    return sums[0], sums[1], sums[2]


# ---------------------------------------------------------------------------
# Glue: framing (torch.stft center=True, reflect pad) and windowed DFT basis
# ---------------------------------------------------------------------------
def _stack_and_frame(x, y, n_fft, hop, n_tiles, tm, dtype):
    """(B, T) x2 -> (n_tiles*2*tm, n_fft): per-tile-interleaved x/y frames, matching
    torch.stft(center=True) framing; padded rows are exactly zero."""
    # TODO(synk): framing stays in XLA (hop-duplicated frames in HBM); an in-kernel
    # pl.ds-based framer over a VMEM-resident padded signal would remove it.
    B, T = x.shape
    pad = n_fft // 2
    xy = jnp.stack([x, y]).astype(dtype)                         # (2, B, T)
    xyp = jnp.pad(xy, ((0, 0), (0, 0), (pad, pad)), mode="reflect")
    n_frames = (T + 2 * pad - n_fft) // hop + 1
    m = B * n_frames
    idx = jnp.arange(n_frames)[:, None] * hop + jnp.arange(n_fft)[None, :]
    frames = jnp.take(xyp, idx, axis=2)                          # (2, B, n_frames, n_fft)
    frames = frames.reshape(2, m, n_fft)
    frames = jnp.pad(frames, ((0, 0), (0, n_tiles * tm - m), (0, 0)))
    # Interleave x/y per frame tile: grid block t holds tm x-frames then tm y-frames.
    frames = frames.reshape(2, n_tiles, tm, n_fft).transpose(1, 0, 2, 3)
    return frames.reshape(n_tiles * 2 * tm, n_fft)


def _dft_basis(n_fft, win_length, f_pad, dtype):
    """Fused [cos | sin] DFT basis (n_fft, 2*f_pad) with the centered, zero-padded
    periodic Hann window folded in; columns >= n_fft//2+1 (per half) are zero pad."""
    n = np.arange(win_length)
    win = 0.5 - 0.5 * np.cos(2.0 * np.pi * n / win_length)       # torch.hann_window
    lpad = (n_fft - win_length) // 2
    w = np.zeros(n_fft, dtype=np.float64)
    w[lpad:lpad + win_length] = win

    n = np.arange(n_fft)
    k = np.arange(n_fft // 2 + 1)
    ang = 2.0 * np.pi * np.outer(n, k) / n_fft
    cos_b = np.zeros((n_fft, f_pad), dtype=np.float32)
    sin_b = np.zeros((n_fft, f_pad), dtype=np.float32)
    cos_b[:, :k.size] = w[:, None] * np.cos(ang)
    sin_b[:, :k.size] = w[:, None] * np.sin(ang)
    return jnp.asarray(np.concatenate([cos_b, sin_b], axis=1), dtype=dtype)


def _tiling(m, frame_tile):
    tm = min(_round_up(frame_tile, 16), _round_up(m, 16))
    n_tiles = _cdiv(m, tm)
    n_parallel = 2 if n_tiles >= 2 else 1     # v7x: one chunk per TensorCore
    inner_tiles = _cdiv(n_tiles, n_parallel)
    return tm, n_parallel, inner_tiles


# ---------------------------------------------------------------------------
# MultiResolutionSTFTLoss forward
# ---------------------------------------------------------------------------
def multi_resolution_stft_loss(x, y, cfg, *, compute_dtype=jnp.bfloat16, frame_tile=256):
    fft_sizes = cfg["fft_sizes"] if cfg["fft_sizes"] is not None else [1024, 2048, 512]
    hop_sizes = cfg["hop_sizes"] if cfg["hop_sizes"] is not None else [120, 240, 50]
    win_lengths = cfg["win_lengths"] if cfg["win_lengths"] is not None else [600, 1200, 240]
    assert len(fft_sizes) == len(hop_sizes) == len(win_lengths)
    assert cfg["window"] == "hann_window"   # TODO(synk): only hann_window implemented

    B, T = x.shape
    sc_loss = jnp.float32(0.0)
    mag_loss = jnp.float32(0.0)
    for fs, ss, wl in zip(fft_sizes, hop_sizes, win_lengths):
        n_freq = fs // 2 + 1
        f_pad = _round_up(n_freq, 128)                 # lane-dense MXU / VPU work
        n_frames = (T + 2 * (fs // 2) - fs) // ss + 1
        m = B * n_frames
        tm, n_parallel, inner_tiles = _tiling(m, frame_tile)
        n_tiles = n_parallel * inner_tiles

        basis = _dft_basis(fs, wl, f_pad, compute_dtype)
        xyf = _stack_and_frame(x, y, fs, ss, n_tiles, tm, compute_dtype)

        s_diff, s_ref_raw, s_log = _stft_loss_sums(
            xyf, basis, tm=tm, n_parallel=n_parallel, inner_tiles=inner_tiles,
            f_pad=f_pad)

        # Remove the deterministic 1e-7 clamp leakage from padded rows / freq lanes.
        pad_elems = n_tiles * tm * f_pad - m * n_freq
        s_ref = jnp.maximum(s_ref_raw - 1e-7 * pad_elems, 1e-12)

        factor = fs / 2048.0
        sc_loss = sc_loss + jnp.sqrt(s_diff) / jnp.sqrt(s_ref) * factor
        mag_loss = mag_loss + (s_log / (m * n_freq)) * factor

    n_res = len(fft_sizes)
    sc_loss = sc_loss / n_res
    mag_loss = mag_loss / n_res
    return cfg["factor_sc"] * sc_loss, cfg["factor_mag"] * mag_loss


# Pure-JAX f32 reference of the identical math (for correctness checks).
def _ref_loss(x, y, cfg):
    B, T = x.shape
    sc_loss = 0.0
    mag_loss = 0.0
    for fs, ss, wl in zip(cfg["fft_sizes"], cfg["hop_sizes"], cfg["win_lengths"]):
        n_freq = fs // 2 + 1
        pad = fs // 2
        n_frames = (T + 2 * pad - fs) // ss + 1
        basis = _dft_basis(fs, wl, n_freq, jnp.float32)      # no lane padding

        def frames(s):
            sp = jnp.pad(s, ((0, 0), (pad, pad)), mode="reflect")
            idx = jnp.arange(n_frames)[:, None] * ss + jnp.arange(fs)[None, :]
            return jnp.take(sp, idx, axis=1).reshape(B * n_frames, fs)

        def mag(f):
            ri = jnp.matmul(f, basis, precision=lax.Precision.HIGHEST)
            r, im = ri[:, :n_freq], ri[:, n_freq:]
            return jnp.sqrt(jnp.maximum(r * r + im * im, 1e-7))

        xm, ym = mag(frames(x)), mag(frames(y))
        factor = fs / 2048.0
        sc_loss += jnp.linalg.norm(ym - xm) / jnp.linalg.norm(ym) * factor
        mag_loss += jnp.mean(jnp.abs(jnp.log(ym) - jnp.log(xm))) * factor
    n = len(cfg["fft_sizes"])
    return cfg["factor_sc"] * sc_loss / n, cfg["factor_mag"] * mag_loss / n


if __name__ == "__main__":
    cfg = dict(
        factor_sc=0.5,
        factor_mag=0.5,
        fft_sizes=[64, 128, 32],
        hop_sizes=[16, 32, 8],
        win_lengths=[40, 80, 16],
        window="hann_window",
    )

    key = jax.random.PRNGKey(0)
    kx, ky = jax.random.split(key)
    B, T = 2, 256
    x = jax.random.normal(kx, (B, T), dtype=jnp.float32)
    y = jax.random.normal(ky, (B, T), dtype=jnp.float32)

    # Default (bf16 matmul inputs, f32 accumulation).
    loss_bf16 = jax.jit(lambda a, b: multi_resolution_stft_loss(a, b, cfg))
    sc, mag = loss_bf16(x, y)
    jax.block_until_ready((sc, mag))

    # f32 path (same kernel, f32 inputs).
    loss_f32 = jax.jit(lambda a, b: multi_resolution_stft_loss(
        a, b, cfg, compute_dtype=jnp.float32))
    sc32, mag32 = loss_f32(x, y)
    jax.block_until_ready((sc32, mag32))

    # Small frame tile to exercise the multi-tile grid, accumulation and padding paths.
    loss_tiled = jax.jit(lambda a, b: multi_resolution_stft_loss(
        a, b, cfg, compute_dtype=jnp.float32, frame_tile=16))
    sc_t, mag_t = loss_tiled(x, y)
    jax.block_until_ready((sc_t, mag_t))

    sc_ref, mag_ref = _ref_loss(x, y, cfg)
    sc_ref, mag_ref = np.asarray(sc_ref), np.asarray(mag_ref)

    np.testing.assert_allclose(np.asarray(sc32), sc_ref, rtol=2e-2, atol=2e-4)
    np.testing.assert_allclose(np.asarray(mag32), mag_ref, rtol=2e-2, atol=2e-4)
    np.testing.assert_allclose(np.asarray(sc_t), sc_ref, rtol=2e-2, atol=2e-4)
    np.testing.assert_allclose(np.asarray(mag_t), mag_ref, rtol=2e-2, atol=2e-4)
    np.testing.assert_allclose(np.asarray(sc), sc_ref, rtol=4e-2, atol=5e-4)
    np.testing.assert_allclose(np.asarray(mag), mag_ref, rtol=4e-2, atol=5e-4)

    print("KERNEL_OK")
</pallas_src>

<mosaic_0001>
module attributes {stable_mosaic.version = 11 : i64} {
  func.func @_stft_loss_kernel(%arg0: i32, %arg1: i32, %arg2: memref<64x128xbf16, #tpu.memory_space<vmem>>, %arg3: memref<128x256xbf16, #tpu.memory_space<vmem>>, %arg4: memref<1x8x128xf32, #tpu.memory_space<vmem>>) attributes {dimension_semantics = [#tpu.dimension_semantics<parallel>, #tpu.dimension_semantics<arbitrary>], iteration_bounds = array<i64: 1, 1>, scalar_prefetch = 0 : i64, scratch_operands = 0 : i64, tpu.core_type = #tpu.core_type<tc>, window_params = [{transform_indices = @transform_0, window_bounds = array<i64: 64, 128>}, {pipeline_mode = #tpu.pipeline_mode<synchronous>, transform_indices = @transform_1, window_bounds = array<i64: 128, 256>}, {transform_indices = @transform_2, window_bounds = array<i64: 1, 8, 128>}]} {
    %c0_i32 = arith.constant 0 : i32
    %0 = arith.cmpi eq, %arg1, %c0_i32 : i32
    %1 = arith.extui %0 : i1 to i32
    %c0_i32_0 = arith.constant 0 : i32
    %2 = arith.cmpi ne, %1, %c0_i32_0 : i32
    scf.if %2 {
      %cst_18 = arith.constant 0.000000e+00 : f32
      %55 = vector.broadcast %cst_18 : f32 to vector<1x8x128xf32>
      %c0_19 = arith.constant 0 : index
      %c0_20 = arith.constant 0 : index
      %c0_21 = arith.constant 0 : index
      %56 = vector.load %arg4[%c0_19, %c0_20, %c0_21] : memref<1x8x128xf32, #tpu.memory_space<vmem>>, vector<1x8x128xf32>
      tpu.vector_store %arg4[%c0_19, %c0_20, %c0_21], %55 {strides = array<i32>} : memref<1x8x128xf32, #tpu.memory_space<vmem>>, vector<1x8x128xf32>,
    } else {
    }
    %c0 = arith.constant 0 : index
    %c0_1 = arith.constant 0 : index
    %3 = vector.load %arg2[%c0, %c0_1] : memref<64x128xbf16, #tpu.memory_space<vmem>>, vector<64x128xbf16>
    %c0_2 = arith.constant 0 : index
    %c0_3 = arith.constant 0 : index
    %4 = vector.load %arg3[%c0_2, %c0_3] : memref<128x256xbf16, #tpu.memory_space<vmem>>, vector<128x256xbf16>
    %cst = arith.constant dense<0.000000e+00> : vector<64x256xf32>
    %5 = tpu.matmul %3, %4, %cst {dimension_numbers = #tpu.dot_dimension_numbers<[1], [0], [0], [1], [0, 0, 1, 1], [], []>} : vector<64x128xbf16>, vector<128x256xbf16>, vector<64x256xf32> -> vector<64x256xf32>
    %6 = arith.mulf %5, %5 : vector<64x256xf32>
    %7 = vector.extract_strided_slice %6 {offsets = [0, 0], sizes = [64, 128], strides = [1, 1]} : vector<64x256xf32> to vector<64x128xf32>
    %8 = vector.extract_strided_slice %6 {offsets = [0, 128], sizes = [64, 128], strides = [1, 1]} : vector<64x256xf32> to vector<64x128xf32>
    %9 = arith.addf %7, %8 : vector<64x128xf32>
    %cst_4 = arith.constant 1.000000e-07 : f32
    %10 = vector.broadcast %cst_4 : f32 to vector<64x128xf32>
    %11 = arith.maximumf %9, %10 : vector<64x128xf32>
    %12 = math.sqrt %11 : vector<64x128xf32>
    %13 = vector.extract_strided_slice %12 {offsets = [0, 0], sizes = [32, 128], strides = [1, 1]} : vector<64x128xf32> to vector<32x128xf32>
    %14 = vector.extract_strided_slice %12 {offsets = [32, 0], sizes = [32, 128], strides = [1, 1]} : vector<64x128xf32> to vector<32x128xf32>
    %15 = arith.subf %14, %13 : vector<32x128xf32>
    %16 = arith.mulf %15, %15 : vector<32x128xf32>
    %17 = vector.shape_cast %16 : vector<32x128xf32> to vector<1x32x128xf32>
    %cst_5 = arith.constant dense<0.000000e+00> : vector<1xf32>
    %18 = vector.multi_reduction <add>, %17, %cst_5 [1, 2] : vector<1x32x128xf32> to vector<1xf32>
    %19 = vector.shape_cast %18 : vector<1xf32> to vector<1x1x1xf32>
    %20 = vector.extract %19[0, 0, 0] : f32 from vector<1x1x1xf32>
    %21 = vector.extract_strided_slice %11 {offsets = [32, 0], sizes = [32, 128], strides = [1, 1]} : vector<64x128xf32> to vector<32x128xf32>
    %22 = vector.shape_cast %21 : vector<32x128xf32> to vector<1x32x128xf32>
    %cst_6 = arith.constant dense<0.000000e+00> : vector<1xf32>
    %23 = vector.multi_reduction <add>, %22, %cst_6 [1, 2] : vector<1x32x128xf32> to vector<1xf32>
    %24 = vector.shape_cast %23 : vector<1xf32> to vector<1x1x1xf32>
    %25 = vector.extract %24[0, 0, 0] : f32 from vector<1x1x1xf32>
    %26 = math.log %14 : vector<32x128xf32>
    %27 = math.log %13 : vector<32x128xf32>
    %28 = arith.subf %26, %27 : vector<32x128xf32>
    %29 = math.absf %28 : vector<32x128xf32>
    %30 = vector.shape_cast %29 : vector<32x128xf32> to vector<1x32x128xf32>
    %cst_7 = arith.constant dense<0.000000e+00> : vector<1xf32>
    %31 = vector.multi_reduction <add>, %30, %cst_7 [1, 2] : vector<1x32x128xf32> to vector<1xf32>
    %32 = vector.shape_cast %31 : vector<1xf32> to vector<1x1x1xf32>
    %33 = vector.extract %32[0, 0, 0] : f32 from vector<1x1x1xf32>
    %34 = tpu.iota {dimensions = array<i32: 2>} : vector<1x8x128xi32>
    %c0_8 = arith.constant 0 : index
    %c0_9 = arith.constant 0 : index
    %c0_10 = arith.constant 0 : index
    %35 = vector.load %arg4[%c0_8, %c0_9, %c0_10] : memref<1x8x128xf32, #tpu.memory_space<vmem>>, vector<1x8x128xf32>
    %c0_i32_11 = arith.constant 0 : i32
    %36 = vector.broadcast %c0_i32_11 : i32 to vector<1x8x128xi32>
    %37 = arith.cmpi eq, %34, %36 : vector<1x8x128xi32>
    %cst_12 = arith.constant 0.000000e+00 : f32
    %38 = vector.broadcast %20 : f32 to vector<1x8x128xf32>
    %39 = vector.broadcast %cst_12 : f32 to vector<1x8x128xf32>
    %40 = arith.select %37, %38, %39 : vector<1x8x128xi1>, vector<1x8x128xf32>
    %c1_i32 = arith.constant 1 : i32
    %41 = vector.broadcast %c1_i32 : i32 to vector<1x8x128xi32>
    %42 = arith.cmpi eq, %34, %41 : vector<1x8x128xi32>
    %cst_13 = arith.constant 0.000000e+00 : f32
    %43 = vector.broadcast %25 : f32 to vector<1x8x128xf32>
    %44 = vector.broadcast %cst_13 : f32 to vector<1x8x128xf32>
    %45 = arith.select %42, %43, %44 : vector<1x8x128xi1>, vector<1x8x128xf32>
    %46 = arith.addf %40, %45 : vector<1x8x128xf32>
    %c2_i32 = arith.constant 2 : i32
    %47 = vector.broadcast %c2_i32 : i32 to vector<1x8x128xi32>
    %48 = arith.cmpi eq, %34, %47 : vector<1x8x128xi32>
    %cst_14 = arith.constant 0.000000e+00 : f32
    %49 = vector.broadcast %33 : f32 to vector<1x8x128xf32>
    %50 = vector.broadcast %cst_14 : f32 to vector<1x8x128xf32>
    %51 = arith.select %48, %49, %50 : vector<1x8x128xi1>, vector<1x8x128xf32>
    %52 = arith.addf %46, %51 : vector<1x8x128xf32>
    %53 = arith.addf %35, %52 : vector<1x8x128xf32>
    %c0_15 = arith.constant 0 : index
    %c0_16 = arith.constant 0 : index
    %c0_17 = arith.constant 0 : index
    %54 = vector.load %arg4[%c0_15, %c0_16, %c0_17] : memref<1x8x128xf32, #tpu.memory_space<vmem>>, vector<1x8x128xf32>
    tpu.vector_store %arg4[%c0_15, %c0_16, %c0_17], %53 {strides = array<i32>} : memref<1x8x128xf32, #tpu.memory_space<vmem>>, vector<1x8x128xf32>,
    return
  }
  func.func @transform_0(%arg0: i32, %arg1: i32) -> (i32, i32) {
    %c1_i32 = arith.constant 1 : i32
    %0 = arith.muli %arg0, %c1_i32 : i32
    %1 = arith.addi %0, %arg1 : i32
    %c0_i32 = arith.constant 0 : i32
    %c0_i32_0 = arith.constant 0 : i32
    return %1, %c0_i32 : i32, i32
  }
  func.func @transform_1(%arg0: i32, %arg1: i32) -> (i32, i32) {
    %c0_i32 = arith.constant 0 : i32
    %c0_i32_0 = arith.constant 0 : i32
    %c0_i32_1 = arith.constant 0 : i32
    return %c0_i32, %c0_i32_0 : i32, i32
  }
  func.func @transform_2(%arg0: i32, %arg1: i32) -> (i32, i32, i32) {
    %c0_i32 = arith.constant 0 : i32
    %c0_i32_0 = arith.constant 0 : i32
    %c0_i32_1 = arith.constant 0 : i32
    return %arg0, %c0_i32, %c0_i32_0 : i32, i32, i32
  }
}

module attributes {stable_mosaic.version = 11 : i64} {
  func.func @_stft_loss_kernel(%arg0: i32, %arg1: i32, %arg2: memref<96x64xbf16, #tpu.memory_space<vmem>>, %arg3: memref<64x256xbf16, #tpu.memory_space<vmem>>, %arg4: memref<1x8x128xf32, #tpu.memory_space<vmem>>) attributes {dimension_semantics = [#tpu.dimension_semantics<parallel>, #tpu.dimension_semantics<arbitrary>], iteration_bounds = array<i64: 1, 1>, scalar_prefetch = 0 : i64, scratch_operands = 0 : i64, tpu.core_type = #tpu.core_type<tc>, window_params = [{transform_indices = @transform_0, window_bounds = array<i64: 96, 64>}, {pipeline_mode = #tpu.pipeline_mode<synchronous>, transform_indices = @transform_1, window_bounds = array<i64: 64, 256>}, {transform_indices = @transform_2, window_bounds = array<i64: 1, 8, 128>}]} {
    %c0_i32 = arith.constant 0 : i32
    %0 = arith.cmpi eq, %arg1, %c0_i32 : i32
    %1 = arith.extui %0 : i1 to i32
    %c0_i32_0 = arith.constant 0 : i32
    %2 = arith.cmpi ne, %1, %c0_i32_0 : i32
    scf.if %2 {
      %cst_18 = arith.constant 0.000000e+00 : f32
      %55 = vector.broadcast %cst_18 : f32 to vector<1x8x128xf32>
      %c0_19 = arith.constant 0 : index
      %c0_20 = arith.constant 0 : index
      %c0_21 = arith.constant 0 : index
      %56 = vector.load %arg4[%c0_19, %c0_20, %c0_21] : memref<1x8x128xf32, #tpu.memory_space<vmem>>, vector<1x8x128xf32>
      tpu.vector_store %arg4[%c0_19, %c0_20, %c0_21], %55 {strides = array<i32>} : memref<1x8x128xf32, #tpu.memory_space<vmem>>, vector<1x8x128xf32>,
    } else {
    }
    %c0 = arith.constant 0 : index
    %c0_1 = arith.constant 0 : index
    %3 = vector.load %arg2[%c0, %c0_1] : memref<96x64xbf16, #tpu.memory_space<vmem>>, vector<96x64xbf16>
    %c0_2 = arith.constant 0 : index
    %c0_3 = arith.constant 0 : index
    %4 = vector.load %arg3[%c0_2, %c0_3] : memref<64x256xbf16, #tpu.memory_space<vmem>>, vector<64x256xbf16>
    %cst = arith.constant dense<0.000000e+00> : vector<96x256xf32>
    %5 = tpu.matmul %3, %4, %cst {dimension_numbers = #tpu.dot_dimension_numbers<[1], [0], [0], [1], [0, 0, 1, 1], [], []>} : vector<96x64xbf16>, vector<64x256xbf16>, vector<96x256xf32> -> vector<96x256xf32>
    %6 = arith.mulf %5, %5 : vector<96x256xf32>
    %7 = vector.extract_strided_slice %6 {offsets = [0, 0], sizes = [96, 128], strides = [1, 1]} : vector<96x256xf32> to vector<96x128xf32>
    %8 = vector.extract_strided_slice %6 {offsets = [0, 128], sizes = [96, 128], strides = [1, 1]} : vector<96x256xf32> to vector<96x128xf32>
    %9 = arith.addf %7, %8 : vector<96x128xf32>
    %cst_4 = arith.constant 1.000000e-07 : f32
    %10 = vector.broadcast %cst_4 : f32 to vector<96x128xf32>
    %11 = arith.maximumf %9, %10 : vector<96x128xf32>
    %12 = math.sqrt %11 : vector<96x128xf32>
    %13 = vector.extract_strided_slice %12 {offsets = [0, 0], sizes = [48, 128], strides = [1, 1]} : vector<96x128xf32> to vector<48x128xf32>
    %14 = vector.extract_strided_slice %12 {offsets = [48, 0], sizes = [48, 128], strides = [1, 1]} : vector<96x128xf32> to vector<48x128xf32>
    %15 = arith.subf %14, %13 : vector<48x128xf32>
    %16 = arith.mulf %15, %15 : vector<48x128xf32>
    %17 = vector.shape_cast %16 : vector<48x128xf32> to vector<1x48x128xf32>
    %cst_5 = arith.constant dense<0.000000e+00> : vector<1xf32>
    %18 = vector.multi_reduction <add>, %17, %cst_5 [1, 2] : vector<1x48x128xf32> to vector<1xf32>
    %19 = vector.shape_cast %18 : vector<1xf32> to vector<1x1x1xf32>
    %20 = vector.extract %19[0, 0, 0] : f32 from vector<1x1x1xf32>
    %21 = vector.extract_strided_slice %11 {offsets = [48, 0], sizes = [48, 128], strides = [1, 1]} : vector<96x128xf32> to vector<48x128xf32>
    %22 = vector.shape_cast %21 : vector<48x128xf32> to vector<1x48x128xf32>
    %cst_6 = arith.constant dense<0.000000e+00> : vector<1xf32>
    %23 = vector.multi_reduction <add>, %22, %cst_6 [1, 2] : vector<1x48x128xf32> to vector<1xf32>
    %24 = vector.shape_cast %23 : vector<1xf32> to vector<1x1x1xf32>
    %25 = vector.extract %24[0, 0, 0] : f32 from vector<1x1x1xf32>
    %26 = math.log %14 : vector<48x128xf32>
    %27 = math.log %13 : vector<48x128xf32>
    %28 = arith.subf %26, %27 : vector<48x128xf32>
    %29 = math.absf %28 : vector<48x128xf32>
    %30 = vector.shape_cast %29 : vector<48x128xf32> to vector<1x48x128xf32>
    %cst_7 = arith.constant dense<0.000000e+00> : vector<1xf32>
    %31 = vector.multi_reduction <add>, %30, %cst_7 [1, 2] : vector<1x48x128xf32> to vector<1xf32>
    %32 = vector.shape_cast %31 : vector<1xf32> to vector<1x1x1xf32>
    %33 = vector.extract %32[0, 0, 0] : f32 from vector<1x1x1xf32>
    %34 = tpu.iota {dimensions = array<i32: 2>} : vector<1x8x128xi32>
    %c0_8 = arith.constant 0 : index
    %c0_9 = arith.constant 0 : index
    %c0_10 = arith.constant 0 : index
    %35 = vector.load %arg4[%c0_8, %c0_9, %c0_10] : memref<1x8x128xf32, #tpu.memory_space<vmem>>, vector<1x8x128xf32>
    %c0_i32_11 = arith.constant 0 : i32
    %36 = vector.broadcast %c0_i32_11 : i32 to vector<1x8x128xi32>
    %37 = arith.cmpi eq, %34, %36 : vector<1x8x128xi32>
    %cst_12 = arith.constant 0.000000e+00 : f32
    %38 = vector.broadcast %20 : f32 to vector<1x8x128xf32>
    %39 = vector.broadcast %cst_12 : f32 to vector<1x8x128xf32>
    %40 = arith.select %37, %38, %39 : vector<1x8x128xi1>, vector<1x8x128xf32>
    %c1_i32 = arith.constant 1 : i32
    %41 = vector.broadcast %c1_i32 : i32 to vector<1x8x128xi32>
    %42 = arith.cmpi eq, %34, %41 : vector<1x8x128xi32>
    %cst_13 = arith.constant 0.000000e+00 : f32
    %43 = vector.broadcast %25 : f32 to vector<1x8x128xf32>
    %44 = vector.broadcast %cst_13 : f32 to vector<1x8x128xf32>
    %45 = arith.select %42, %43, %44 : vector<1x8x128xi1>, vector<1x8x128xf32>
    %46 = arith.addf %40, %45 : vector<1x8x128xf32>
    %c2_i32 = arith.constant 2 : i32
    %47 = vector.broadcast %c2_i32 : i32 to vector<1x8x128xi32>
    %48 = arith.cmpi eq, %34, %47 : vector<1x8x128xi32>
    %cst_14 = arith.constant 0.000000e+00 : f32
    %49 = vector.broadcast %33 : f32 to vector<1x8x128xf32>
    %50 = vector.broadcast %cst_14 : f32 to vector<1x8x128xf32>
    %51 = arith.select %48, %49, %50 : vector<1x8x128xi1>, vector<1x8x128xf32>
    %52 = arith.addf %46, %51 : vector<1x8x128xf32>
    %53 = arith.addf %35, %52 : vector<1x8x128xf32>
    %c0_15 = arith.constant 0 : index
    %c0_16 = arith.constant 0 : index
    %c0_17 = arith.constant 0 : index
    %54 = vector.load %arg4[%c0_15, %c0_16, %c0_17] : memref<1x8x128xf32, #tpu.memory_space<vmem>>, vector<1x8x128xf32>
    tpu.vector_store %arg4[%c0_15, %c0_16, %c0_17], %53 {strides = array<i32>} : memref<1x8x128xf32, #tpu.memory_space<vmem>>, vector<1x8x128xf32>,
    return
  }
  func.func @transform_0(%arg0: i32, %arg1: i32) -> (i32, i32) {
    %c1_i32 = arith.constant 1 : i32
    %0 = arith.muli %arg0, %c1_i32 : i32
    %1 = arith.addi %0, %arg1 : i32
    %c0_i32 = arith.constant 0 : i32
    %c0_i32_0 = arith.constant 0 : i32
    return %1, %c0_i32 : i32, i32
  }
  func.func @transform_1(%arg0: i32, %arg1: i32) -> (i32, i32) {
    %c0_i32 = arith.constant 0 : i32
    %c0_i32_0 = arith.constant 0 : i32
    %c0_i32_1 = arith.constant 0 : i32
    return %c0_i32, %c0_i32_0 : i32, i32
  }
  func.func @transform_2(%arg0: i32, %arg1: i32) -> (i32, i32, i32) {
    %c0_i32 = arith.constant 0 : i32
    %c0_i32_0 = arith.constant 0 : i32
    %c0_i32_1 = arith.constant 0 : i32
    return %arg0, %c0_i32, %c0_i32_0 : i32, i32, i32
  }
}

module attributes {stable_mosaic.version = 11 : i64} {
  func.func @_stft_loss_kernel(%arg0: i32, %arg1: i32, %arg2: memref<160x32xbf16, #tpu.memory_space<vmem>>, %arg3: memref<32x256xbf16, #tpu.memory_space<vmem>>, %arg4: memref<1x8x128xf32, #tpu.memory_space<vmem>>) attributes {dimension_semantics = [#tpu.dimension_semantics<parallel>, #tpu.dimension_semantics<arbitrary>], iteration_bounds = array<i64: 1, 1>, scalar_prefetch = 0 : i64, scratch_operands = 0 : i64, tpu.core_type = #tpu.core_type<tc>, window_params = [{transform_indices = @transform_0, window_bounds = array<i64: 160, 32>}, {pipeline_mode = #tpu.pipeline_mode<synchronous>, transform_indices = @transform_1, window_bounds = array<i64: 32, 256>}, {transform_indices = @transform_2, window_bounds = array<i64: 1, 8, 128>}]} {
    %c0_i32 = arith.constant 0 : i32
    %0 = arith.cmpi eq, %arg1, %c0_i32 : i32
    %1 = arith.extui %0 : i1 to i32
    %c0_i32_0 = arith.constant 0 : i32
    %2 = arith.cmpi ne, %1, %c0_i32_0 : i32
    scf.if %2 {
      %cst_18 = arith.constant 0.000000e+00 : f32
      %55 = vector.broadcast %cst_18 : f32 to vector<1x8x128xf32>
      %c0_19 = arith.constant 0 : index
      %c0_20 = arith.constant 0 : index
      %c0_21 = arith.constant 0 : index
      %56 = vector.load %arg4[%c0_19, %c0_20, %c0_21] : memref<1x8x128xf32, #tpu.memory_space<vmem>>, vector<1x8x128xf32>
      tpu.vector_store %arg4[%c0_19, %c0_20, %c0_21], %55 {strides = array<i32>} : memref<1x8x128xf32, #tpu.memory_space<vmem>>, vector<1x8x128xf32>,
    } else {
    }
    %c0 = arith.constant 0 : index
    %c0_1 = arith.constant 0 : index
    %3 = vector.load %arg2[%c0, %c0_1] : memref<160x32xbf16, #tpu.memory_space<vmem>>, vector<160x32xbf16>
    %c0_2 = arith.constant 0 : index
    %c0_3 = arith.constant 0 : index
    %4 = vector.load %arg3[%c0_2, %c0_3] : memref<32x256xbf16, #tpu.memory_space<vmem>>, vector<32x256xbf16>
    %cst = arith.constant dense<0.000000e+00> : vector<160x256xf32>
    %5 = tpu.matmul %3, %4, %cst {dimension_numbers = #tpu.dot_dimension_numbers<[1], [0], [0], [1], [0, 0, 1, 1], [], []>} : vector<160x32xbf16>, vector<32x256xbf16>, vector<160x256xf32> -> vector<160x256xf32>
    %6 = arith.mulf %5, %5 : vector<160x256xf32>
    %7 = vector.extract_strided_slice %6 {offsets = [0, 0], sizes = [160, 128], strides = [1, 1]} : vector<160x256xf32> to vector<160x128xf32>
    %8 = vector.extract_strided_slice %6 {offsets = [0, 128], sizes = [160, 128], strides = [1, 1]} : vector<160x256xf32> to vector<160x128xf32>
    %9 = arith.addf %7, %8 : vector<160x128xf32>
    %cst_4 = arith.constant 1.000000e-07 : f32
    %10 = vector.broadcast %cst_4 : f32 to vector<160x128xf32>
    %11 = arith.maximumf %9, %10 : vector<160x128xf32>
    %12 = math.sqrt %11 : vector<160x128xf32>
    %13 = vector.extract_strided_slice %12 {offsets = [0, 0], sizes = [80, 128], strides = [1, 1]} : vector<160x128xf32> to vector<80x128xf32>
    %14 = vector.extract_strided_slice %12 {offsets = [80, 0], sizes = [80, 128], strides = [1, 1]} : vector<160x128xf32> to vector<80x128xf32>
    %15 = arith.subf %14, %13 : vector<80x128xf32>
    %16 = arith.mulf %15, %15 : vector<80x128xf32>
    %17 = vector.shape_cast %16 : vector<80x128xf32> to vector<1x80x128xf32>
    %cst_5 = arith.constant dense<0.000000e+00> : vector<1xf32>
    %18 = vector.multi_reduction <add>, %17, %cst_5 [1, 2] : vector<1x80x128xf32> to vector<1xf32>
    %19 = vector.shape_cast %18 : vector<1xf32> to vector<1x1x1xf32>
    %20 = vector.extract %19[0, 0, 0] : f32 from vector<1x1x1xf32>
    %21 = vector.extract_strided_slice %11 {offsets = [80, 0], sizes = [80, 128], strides = [1, 1]} : vector<160x128xf32> to vector<80x128xf32>
    %22 = vector.shape_cast %21 : vector<80x128xf32> to vector<1x80x128xf32>
    %cst_6 = arith.constant dense<0.000000e+00> : vector<1xf32>
    %23 = vector.multi_reduction <add>, %22, %cst_6 [1, 2] : vector<1x80x128xf32> to vector<1xf32>
    %24 = vector.shape_cast %23 : vector<1xf32> to vector<1x1x1xf32>
    %25 = vector.extract %24[0, 0, 0] : f32 from vector<1x1x1xf32>
    %26 = math.log %14 : vector<80x128xf32>
    %27 = math.log %13 : vector<80x128xf32>
    %28 = arith.subf %26, %27 : vector<80x128xf32>
    %29 = math.absf %28 : vector<80x128xf32>
    %30 = vector.shape_cast %29 : vector<80x128xf32> to vector<1x80x128xf32>
    %cst_7 = arith.constant dense<0.000000e+00> : vector<1xf32>
    %31 = vector.multi_reduction <add>, %30, %cst_7 [1, 2] : vector<1x80x128xf32> to vector<1xf32>
    %32 = vector.shape_cast %31 : vector<1xf32> to vector<1x1x1xf32>
    %33 = vector.extract %32[0, 0, 0] : f32 from vector<1x1x1xf32>
    %34 = tpu.iota {dimensions = array<i32: 2>} : vector<1x8x128xi32>
    %c0_8 = arith.constant 0 : index
    %c0_9 = arith.constant 0 : index
    %c0_10 = arith.constant 0 : index
    %35 = vector.load %arg4[%c0_8, %c0_9, %c0_10] : memref<1x8x128xf32, #tpu.memory_space<vmem>>, vector<1x8x128xf32>
    %c0_i32_11 = arith.constant 0 : i32
    %36 = vector.broadcast %c0_i32_11 : i32 to vector<1x8x128xi32>
    %37 = arith.cmpi eq, %34, %36 : vector<1x8x128xi32>
    %cst_12 = arith.constant 0.000000e+00 : f32
    %38 = vector.broadcast %20 : f32 to vector<1x8x128xf32>
    %39 = vector.broadcast %cst_12 : f32 to vector<1x8x128xf32>
    %40 = arith.select %37, %38, %39 : vector<1x8x128xi1>, vector<1x8x128xf32>
    %c1_i32 = arith.constant 1 : i32
    %41 = vector.broadcast %c1_i32 : i32 to vector<1x8x128xi32>
    %42 = arith.cmpi eq, %34, %41 : vector<1x8x128xi32>
    %cst_13 = arith.constant 0.000000e+00 : f32
    %43 = vector.broadcast %25 : f32 to vector<1x8x128xf32>
    %44 = vector.broadcast %cst_13 : f32 to vector<1x8x128xf32>
    %45 = arith.select %42, %43, %44 : vector<1x8x128xi1>, vector<1x8x128xf32>
    %46 = arith.addf %40, %45 : vector<1x8x128xf32>
    %c2_i32 = arith.constant 2 : i32
    %47 = vector.broadcast %c2_i32 : i32 to vector<1x8x128xi32>
    %48 = arith.cmpi eq, %34, %47 : vector<1x8x128xi32>
    %cst_14 = arith.constant 0.000000e+00 : f32
    %49 = vector.broadcast %33 : f32 to vector<1x8x128xf32>
    %50 = vector.broadcast %cst_14 : f32 to vector<1x8x128xf32>
    %51 = arith.select %48, %49, %50 : vector<1x8x128xi1>, vector<1x8x128xf32>
    %52 = arith.addf %46, %51 : vector<1x8x128xf32>
    %53 = arith.addf %35, %52 : vector<1x8x128xf32>
    %c0_15 = arith.constant 0 : index
    %c0_16 = arith.constant 0 : index
    %c0_17 = arith.constant 0 : index
    %54 = vector.load %arg4[%c0_15, %c0_16, %c0_17] : memref<1x8x128xf32, #tpu.memory_space<vmem>>, vector<1x8x128xf32>
    tpu.vector_store %arg4[%c0_15, %c0_16, %c0_17], %53 {strides = array<i32>} : memref<1x8x128xf32, #tpu.memory_space<vmem>>, vector<1x8x128xf32>,
    return
  }
  func.func @transform_0(%arg0: i32, %arg1: i32) -> (i32, i32) {
    %c1_i32 = arith.constant 1 : i32
    %0 = arith.muli %arg0, %c1_i32 : i32
    %1 = arith.addi %0, %arg1 : i32
    %c0_i32 = arith.constant 0 : i32
    %c0_i32_0 = arith.constant 0 : i32
    return %1, %c0_i32 : i32, i32
  }
  func.func @transform_1(%arg0: i32, %arg1: i32) -> (i32, i32) {
    %c0_i32 = arith.constant 0 : i32
    %c0_i32_0 = arith.constant 0 : i32
    %c0_i32_1 = arith.constant 0 : i32
    return %c0_i32, %c0_i32_0 : i32, i32
  }
  func.func @transform_2(%arg0: i32, %arg1: i32) -> (i32, i32, i32) {
    %c0_i32 = arith.constant 0 : i32
    %c0_i32_0 = arith.constant 0 : i32
    %c0_i32_1 = arith.constant 0 : i32
    return %arg0, %c0_i32, %c0_i32_0 : i32, i32, i32
  }
}

</mosaic_0001>

<bundles_post_ra>
// kernel: _lambda_.4
= control target key start
LH: loop header
LB: loop body
LE: loop exit
PB: predicated region body
PF: predicated region fallthrough
CT: control target
= control target key end

     0   :  { %v526_v1 = vmov 0   ;;  %s681_s1 = inlined_call_operand.vmem [shape: bf16[128,256], index: 1, kind: input, shape index: {}]   ;;  %s682_s0 = inlined_call_operand.vmem [shape: bf16[64,128], index: 0, kind: input, shape index: {}]   ;;  %s683_s2 = inlined_call_operand.vmem [shape: f32[1,8,128], index: 2, kind: output, shape index: {}]  }
   0x1   :  { %v466_v0 = vld [vmem:[%s681_s1 + $0x4] ss:$8 sps:$4 sm:$0xff]   ;;  %199 = vmatprep.mubr.bf16.mxu0 %v526_v1  ;;  %219 = vmatprep.mubr.bf16.mxu1 %v526_v1  ;;  %v468_v2 = vld [vmem:[%s681_s1] ss:$8 sps:$4 sm:$0xff]   ;;  %v469_v3 = vld [vmem:[%s681_s1 + $0x14] ss:$8 sps:$4 sm:$0xff]  }
   0x2   :  { %167 = vmatprep.subr.bf16.mxu0 %v466_v0  ;;  %442 = vmatprep.subr.bf16.mxu1 %v466_v0  ;;  %v471_v4 = vld [vmem:[%s681_s1 + $0x10] ss:$8 sps:$4 sm:$0xff]   ;;  %v472_v5 = vld [vmem:[%s681_s1 + $0x24] ss:$8 sps:$4 sm:$0xff]   ;;  %v474_v6 = vld [vmem:[%s681_s1 + $0x20] ss:$8 sps:$4 sm:$0xff]  }
   0x3   :  { %168 = vmatpush1.bf16.msra.mxu0 %v468_v2  ;;  %450 = vmatpush1.bf16.msra.mxu1 %v468_v2  ;;  %v475_v7 = vld [vmem:[%s681_s1 + $0x34] ss:$8 sps:$4 sm:$0xff]   ;;  %v477_v8 = vld [vmem:[%s681_s1 + $0x30] ss:$8 sps:$4 sm:$0xff]   ;;  %v478_v9 = vld [vmem:[%s681_s1 + $0x44] ss:$8 sps:$4 sm:$0xff]  }
   0x4   :  { %169 = vmatprep.subr.bf16.mxu0 %v469_v3  ;;  %443 = vmatprep.subr.bf16.mxu1 %v469_v3  ;;  %v480_v10 = vld [vmem:[%s681_s1 + $0x40] ss:$8 sps:$4 sm:$0xff]   ;;  %v481_v11 = vld [vmem:[%s681_s1 + $0x54] ss:$8 sps:$4 sm:$0xff]   ;;  %v483_v12 = vld [vmem:[%s681_s1 + $0x50] ss:$8 sps:$4 sm:$0xff]  }
   0x5   :  { %v484_v13 = vld [vmem:[%s681_s1 + $0x64] ss:$8 sps:$4 sm:$0xff]   ;;  %v486_v14 = vld [vmem:[%s681_s1 + $0x60] ss:$8 sps:$4 sm:$0xff]   ;;  %v487_v15 = vld [vmem:[%s681_s1 + $0x74] ss:$8 sps:$4 sm:$0xff]  }
   0x6   :  { %v489_v16 = vld [vmem:[%s681_s1 + $0x70] ss:$8 sps:$4 sm:$0xff]   ;;  %v490_v17 = vld [vmem:[%s682_s0] sm:$0xff]   ;;  %v492_v19 = vld [vmem:[%s682_s0 + $0x8] sm:$0xff]  }
   0x7   :  { %170 = vmatpush1.bf16.msra.mxu0 %v471_v4  ;;  %451 = vmatpush1.bf16.msra.mxu1 %v471_v4  ;;  %v491_v18 = vld [vmem:[%s682_s0 + $0x10] sm:$0xff]   ;;  %v493_v20 = vld [vmem:[%s682_s0 + $0x18] sm:$0xff]  }
   0x8   :  { %171 = vmatprep.subr.bf16.mxu0 %v472_v5  ;;  %444 = vmatprep.subr.bf16.mxu1 %v472_v5 }
   0xb   :  { %172 = vmatpush1.bf16.msra.mxu0 %v474_v6  ;;  %452 = vmatpush1.bf16.msra.mxu1 %v474_v6 }
   0xc   :  { %173 = vmatprep.subr.bf16.mxu0 %v475_v7  ;;  %445 = vmatprep.subr.bf16.mxu1 %v475_v7 }
   0xf   :  { %174 = vmatpush1.bf16.msra.mxu0 %v477_v8  ;;  %453 = vmatpush1.bf16.msra.mxu1 %v477_v8 }
  0x10   :  { %175 = vmatprep.subr.bf16.mxu0 %v478_v9  ;;  %446 = vmatprep.subr.bf16.mxu1 %v478_v9 }
  0x13   :  { %176 = vmatpush1.bf16.msra.mxu0 %v480_v10  ;;  %454 = vmatpush1.bf16.msra.mxu1 %v480_v10 }
  0x14   :  { %177 = vmatprep.subr.bf16.mxu0 %v481_v11  ;;  %447 = vmatprep.subr.bf16.mxu1 %v481_v11 }
  0x17   :  { %178 = vmatpush1.bf16.msra.mxu0 %v483_v12  ;;  %455 = vmatpush1.bf16.msra.mxu1 %v483_v12 }
  0x18   :  { %179 = vmatprep.subr.bf16.mxu0 %v484_v13  ;;  %448 = vmatprep.subr.bf16.mxu1 %v484_v13 }
  0x1b   :  { %180 = vmatpush1.bf16.msra.mxu0 %v486_v14  ;;  %456 = vmatpush1.bf16.msra.mxu1 %v486_v14 }
  0x1c   :  { %181 = vmatprep.subr.bf16.mxu0 %v487_v15  ;;  %449 = vmatprep.subr.bf16.mxu1 %v487_v15 }
  0x1f   :  { %182 = vmatpush1.bf16.msra.mxu0 %v489_v16  ;;  %457 = vmatpush1.bf16.msra.mxu1 %v489_v16 }
  0x22   :  { %200 = vmatmul.mubr.bf16.vlgmr.msra.gmra.mrb[0].mxu0 %v490_v17  ;;  %220 = vmatmul.mubr.bf16.vlgmr.msra.gmra.mrb[0].mxu1 %v491_v18 }
  0x23   :  { %209 = vmatprep.mubr.bf16.mxu0 %v526_v1  ;;  %229 = vmatprep.mubr.bf16.mxu1 %v526_v1 }
  0x2a   :  { %210 = vmatmul.mubr.bf16.gmra.mrb[4].mxu0 %v492_v19  ;;  %230 = vmatmul.mubr.bf16.gmra.mrb[4].mxu1 %v493_v20 }
  0xf5   :  { %v201_v21 = vpop.f32.mrb[0].mxu0  ;;  %v221_v22 = vpop.f32.mrb[0].mxu1 }
  0xf6   :  { %v240_v23 = vmul.f32 %v201_v21, %v201_v21  ;;  %v248_v24 = vmul.f32 %v221_v22, %v221_v22  ;;  %v203_v25 = vpop.f32.mrb[1].mxu0  ;;  %v223_v26 = vpop.f32.mrb[1].mxu1 }
  0xf7   :  { %v241_v27 = vmul.f32 %v203_v25, %v203_v25  ;;  %v249_v28 = vmul.f32 %v223_v26, %v223_v26  ;;  %v205_v29 = vpop.f32.mrb[2].mxu0  ;;  %v225_v30 = vpop.f32.mrb[2].mxu1 }
  0xf8   :  { %v242_v31 = vmul.f32 %v205_v29, %v205_v29  ;;  %v250_v32 = vmul.f32 %v225_v30, %v225_v30  ;;  %v207_v33 = vpop.f32.mrb[3].mxu0  ;;  %v227_v34 = vpop.f32.mrb[3].mxu1 }
  0xf9   :  { %v256_v35 = vadd.f32 %v241_v27, %v240_v23  ;;  %v260_v36 = vadd.f32 %v249_v28, %v248_v24  ;;  %v243_v37 = vmul.f32 %v207_v33, %v207_v33  ;;  %v251_v38 = vmul.f32 %v227_v34, %v227_v34 }
  0xfb   :  { %v264_v39 = vmax.f32 %v256_v35, 1e-07  ;;  %v257_v40 = vadd.f32 %v243_v37, %v242_v31  ;;  %v261_v41 = vadd.f32 %v251_v38, %v250_v32  ;;  %v602_v45 = vmax.f32 %v260_v36, 1e-07 }
  0xfd   :  { %494 = vrsqrt.f32 %v264_v39  ;;  %v265_v42 = vmax.f32 %v257_v40, 1e-07  ;;  %v211_v43 = vpop.f32.mrb[4].mxu0  ;;  %v231_v44 = vpop.f32.mrb[4].mxu1  ;;  %v604_v54 = vmax.f32 %v261_v41, 1e-07 }
  0xfe   :  { %v244_v46 = vmul.f32 %v211_v43, %v211_v43  ;;  %v252_v47 = vmul.f32 %v231_v44, %v231_v44  ;;  %v213_v48 = vpop.f32.mrb[5].mxu0  ;;  %v233_v49 = vpop.f32.mrb[5].mxu1  ;;  %vm274_vm0 = vcmp.eq.f32.partialorder %v264_v39, inf  ;;  %vm276_vm1 = vcmp.eq.f32.partialorder %v264_v39, 0.0 }
  0xff   :  { %496 = vrsqrt.f32 %v265_v42  ;;  %v245_v50 = vmul.f32 %v213_v48, %v213_v48  ;;  %v253_v51 = vmul.f32 %v233_v49, %v233_v49  ;;  %v215_v52 = vpop.f32.mrb[6].mxu0  ;;  %v235_v53 = vpop.f32.mrb[6].mxu1  ;;  %v277_v6 = vand.u32 2147483648, %v264_v39 }
 0x100   :  { %v246_v55 = vmul.f32 %v215_v52, %v215_v52  ;;  %v254_v56 = vmul.f32 %v235_v53, %v235_v53  ;;  %v217_v57 = vpop.f32.mrb[7].mxu0  ;;  %v237_v58 = vpop.f32.mrb[7].mxu1  ;;  %498 = vrsqrt.f32 %v602_v45  ;;  %vm281_vm2 = vcmp.eq.f32.partialorder %v265_v42, inf }
 0x101   :  { %v258_v59 = vadd.f32 %v245_v50, %v244_v46  ;;  %v262_v60 = vadd.f32 %v253_v51, %v252_v47  ;;  %v247_v61 = vmul.f32 %v217_v57, %v217_v57  ;;  %v255_v62 = vmul.f32 %v237_v58, %v237_v58 }
 0x102   :  { %500 = vrsqrt.f32 %v604_v54  ;;  %vm283_vm3 = vcmp.eq.f32.partialorder %v265_v42, 0.0  ;;  %v284_v8 = vand.u32 2147483648, %v265_v42  ;;  %vm302_vm4 = vcmp.eq.f32.partialorder %v602_v45, inf }
 0x103   :  { %v607_v63 = vmax.f32 %v258_v59, 1e-07  ;;  %v609_v0 = vmax.f32 %v262_v60, 1e-07  ;;  %v259_v1 = vadd.f32 %v247_v61, %v246_v55  ;;  %v263_v2 = vadd.f32 %v255_v62, %v254_v56 }
 0x104   :  { %vm304_vm5 = vcmp.eq.f32.partialorder %v602_v45, 0.0  ;;  %v305_v10 = vand.u32 2147483648, %v602_v45  ;;  %vm309_vm6 = vcmp.eq.f32.partialorder %v604_v54, inf  ;;  %v348_v13 = vadd.f32 %v604_v54, %v602_v45 }
 0x105   :  { %502 = vrsqrt.f32 %v607_v63  ;;  %v613_v3 = vmax.f32 %v259_v1, 1e-07  ;;  %v615_v4 = vmax.f32 %v263_v2, 1e-07  ;;  %vm288_vm7 = vcmp.eq.f32.partialorder %v607_v63, inf }
 0x106   :  { %504 = vrsqrt.f32 %v609_v0  ;;  %vm290_vm8 = vcmp.eq.f32.partialorder %v607_v63, 0.0  ;;  %vm311_vm9 = vcmp.eq.f32.partialorder %v604_v54, 0.0  ;;  %v291_v17 = vand.u32 2147483648, %v607_v63 }
 0x107   :  { %v495_v5 = vpop.eup %494  ;;  %506 = vrsqrt.f32 %v613_v3  ;;  %v312_v18 = vand.u32 2147483648, %v604_v54  ;;  %v349_v19 = vadd.f32 %v348_v13, %v609_v0  ;;  %vm295_vm10 = vcmp.eq.f32.partialorder %v613_v3, inf }
 0x108   :  { %v273_v7 = vmul.f32 %v495_v5, %v264_v39  ;;  %508 = vrsqrt.f32 %v615_v4  ;;  %vm297_vm11 = vcmp.eq.f32.partialorder %v613_v3, 0.0  ;;  %v298_v23 = vand.u32 2147483648, %v613_v3 }
 0x109   :  { %v497_v9 = vpop.eup %496  ;;  %vm316_vm12 = vcmp.eq.f32.partialorder %v609_v0, inf  ;;  %v350_v24 = vadd.f32 %v349_v19, %v615_v4  ;;  %vm318_vm13 = vcmp.eq.f32.partialorder %v609_v0, 0.0  ;;  %v319_v28 = vand.u32 2147483648, %v609_v0 }
 0x10a   :  { %v275_v11 = vsel %vm274_vm0, %v264_v39, %v273_v7  ;;  %v280_v12 = vmul.f32 %v497_v9, %v265_v42  ;;  %v499_v15 = vpop.eup %498  ;;  %vm323_vm14 = vcmp.eq.f32.partialorder %v615_v4, inf  ;;  %v326_v39 = vand.u32 2147483648, %v615_v4 }
 0x10b   :  { %v278_v14 = vsel %vm276_vm1, %v277_v6, %v275_v11  ;;  %v301_v21 = vmul.f32 %v499_v15, %v602_v45  ;;  %vm325_vm15 = vcmp.eq.f32.partialorder %v615_v4, 0.0 }
 0x10c   :  { %v282_v16 = vsel %vm281_vm2, %v265_v42, %v280_v12  ;;  %510 = vlog2.f32 %v278_v14  ;;  %v501_v22 = vpop.eup %500 }
 0x10d   :  { %v285_v20 = vsel %vm283_vm3, %v284_v8, %v282_v16  ;;  %v303_v26 = vsel %vm302_vm4, %v602_v45, %v301_v21  ;;  %v308_v27 = vmul.f32 %v501_v22, %v604_v54 }
 0x10e   :  { %v306_v31 = vsel %vm304_vm5, %v305_v10, %v303_v26  ;;  %512 = vlog2.f32 %v285_v20 }
 0x10f   :  { %v503_v25 = vpop.eup %502  ;;  %v310_v33 = vsel %vm309_vm6, %v604_v54, %v308_v27  ;;  %v328_v35 = vsub.f32 %v306_v31, %v278_v14  ;;  %514 = vlog2.f32 %v306_v31 }
 0x110   :  { %v505_v29 = vpop.eup %504  ;;  %v287_v30 = vmul.f32 %v503_v25, %v607_v63  ;;  %v313_v38 = vsel %vm311_vm9, %v312_v18, %v310_v33 }
 0x111   :  { %v507_v32 = vpop.eup %506  ;;  %v315_v34 = vmul.f32 %v505_v29, %v609_v0  ;;  %v329_v43 = vsub.f32 %v313_v38, %v285_v20  ;;  %v332_v44 = vmul.f32 %v328_v35, %v328_v35  ;;  %516 = vlog2.f32 %v313_v38 }
 0x112   :  { %v289_v36 = vsel %vm288_vm7, %v607_v63, %v287_v30  ;;  %v294_v37 = vmul.f32 %v507_v32, %v613_v3  ;;  %v509_v40 = vpop.eup %508 }
 0x113   :  { %v292_v41 = vsel %vm290_vm8, %v291_v17, %v289_v36  ;;  %v317_v42 = vsel %vm316_vm12, %v609_v0, %v315_v34  ;;  %v322_v47 = vmul.f32 %v509_v40, %v615_v4  ;;  %v333_v50 = vmul.f32 %v329_v43, %v329_v43 }
 0x114   :  { %v296_v45 = vsel %vm295_vm10, %v613_v3, %v294_v37  ;;  %v320_v46 = vsel %vm318_vm13, %v319_v28, %v317_v42  ;;  %v396_v43 = vlaneseq }
 0x115   :  { %v299_v48 = vsel %vm297_vm11, %v298_v23, %v296_v45  ;;  %v330_v49 = vsub.f32 %v320_v46, %v292_v41  ;;  %518 = vlog2.f32 %v320_v46  ;;  %v324_v51 = vsel %vm323_vm14, %v615_v4, %v322_v47 }
 0x116   :  { %520 = vlog2.f32 %v292_v41  ;;  %v511_v52 = vpop.eup %510  ;;  %v327_v53 = vsel %vm325_vm15, %v326_v39, %v324_v51  ;;  %v336_v55 = vadd.f32 %v333_v50, %v332_v44  ;;  %v397_v44 = vand.u32 127, %v396_v43 }
 0x117   :  { %v334_v54 = vmul.f32 %v330_v49, %v330_v49  ;;  %522 = vlog2.f32 %v299_v48  ;;  %v331_v56 = vsub.f32 %v327_v53, %v299_v48  ;;  %v369_v60 = vmul.f32 0.6931472, %v511_v52 }
 0x118   :  { %524 = vlog2.f32 %v327_v53  ;;  %v513_v58 = vpop.eup %512  ;;  %vm402_vm0 = vcmp.eq.s32.totalorder %v397_v44, 1  ;;  %vm399_vm1 = vcmp.eq.s32.totalorder %v397_v44, 0  ;;  %vm406_vm2 = vcmp.eq.s32.totalorder %v397_v44, 2 }
 0x119   :  { %v337_v57 = vadd.f32 %v336_v55, %v334_v54  ;;  %v335_v59 = vmul.f32 %v331_v56, %v331_v56  ;;  %v515_v61 = vpop.eup %514  ;;  %v371_v0 = vmul.f32 0.6931472, %v513_v58 }
 0x11a   :  { %v361_v63 = vmul.f32 0.6931472, %v515_v61 }
 0x11b   :  { %v338_v62 = vadd.f32 %v337_v57, %v335_v59  ;;  %v517_v1 = vpop.eup %516 }
 0x11c   :  { %v376_v2 = vsub.f32 %v361_v63, %v369_v60  ;;  %v363_v4 = vmul.f32 0.6931472, %v517_v1 }
 0x11d   :  { %339 = vadd.xlane.f32.xlu0 %v338_v62 }
 0x11e   :  { %v377_v9 = vsub.f32 %v363_v4, %v371_v0  ;;  %v380_v14 = vand.u32 2147483647, %v376_v2 }
 0x11f   :  { %v519_v3 = vpop.eup %518 }
 0x120   :  { %v521_v5 = vpop.eup %520  ;;  %v365_v6 = vmul.f32 0.6931472, %v519_v3  ;;  %v381_v15 = vand.u32 2147483647, %v377_v9 }
 0x121   :  { %v523_v7 = vpop.eup %522  ;;  %v373_v8 = vmul.f32 0.6931472, %v521_v5  ;;  %351 = vadd.xlane.f32.xlu0 %v350_v24 }
 0x122   :  { %v525_v10 = vpop.eup %524  ;;  %v375_v11 = vmul.f32 0.6931472, %v523_v7  ;;  %v384_v18 = vadd.f32 %v381_v15, %v380_v14 }
 0x123   :  { %v367_v12 = vmul.f32 0.6931472, %v525_v10  ;;  %v378_v13 = vsub.f32 %v365_v6, %v373_v8 }
 0x125   :  { %v379_v16 = vsub.f32 %v367_v12, %v375_v11  ;;  %v382_v17 = vand.u32 2147483647, %v378_v13 }
 0x127   :  { %v383_v19 = vand.u32 2147483647, %v379_v16  ;;  %v385_v20 = vadd.f32 %v384_v18, %v382_v17 }
 0x129   :  { %v386_v21 = vadd.f32 %v385_v20, %v383_v19 }
 0x12b   :  { %387 = vadd.xlane.f32.xlu1 %v386_v21 }
 0x1aa   :  { %v340_v22 = vpop.xlane.xlu0 %339 }
 0x1ab   :  { %v341_v23 = vrot.slane %v340_v22, 4 }
 0x1ad   :  { %v342_v25 = vadd.f32 %v341_v23, %v340_v22 }
 0x1ae   :  { %v352_v26 = vpop.xlane.xlu0 %351 }
 0x1af   :  { %v343_v27 = vrot.slane %v342_v25, 2  ;;  %v353_v28 = vrot.slane %v352_v26, 4 }
 0x1b1   :  { %v354_v29 = vadd.f32 %v353_v28, %v352_v26  ;;  %v344_v24 = vadd.f32 %v343_v27, %v342_v25 }
 0x1b3   :  { %v355_v30 = vrot.slane %v354_v29, 2  ;;  %v345_v31 = vrot.slane %v344_v24, 1 }
 0x1b5   :  { %v356_v32 = vadd.f32 %v355_v30, %v354_v29  ;;  %v346_v33 = vadd.f32 %v345_v31, %v344_v24 }
 0x1b7   :  { %458 = vpush %v346_v33  ;;  %v357_v35 = vrot.slane %v356_v32, 1 }
 0x1b8   :  { %v388_v34 = vpop.xlane.xlu1 %387 }
 0x1b9   :  { %v389_v36 = vrot.slane %v388_v34, 4  ;;  %v358_v37 = vadd.f32 %v357_v35, %v356_v32 }
 0x1bb   :  { %v390_v38 = vadd.f32 %v389_v36, %v388_v34  ;;  %460 = vpush %v358_v37 }
 0x1bd   :  { %v391_v39 = vrot.slane %v390_v38, 2 }
 0x1bf   :  { %v392_v40 = vadd.f32 %v391_v39, %v390_v38 }
 0x1c1   :  { %v393_v41 = vrot.slane %v392_v40, 1 }
 0x1c3   :  { %v394_v42 = vadd.f32 %v393_v41, %v392_v40 }
 0x1c5   :  { %462 = vpush %v394_v42 }
 0x1e8   :  { %s459_s0 = spop %458 }
 0x1e9   :  { %v400_v46 = vstv %s459_s0 }
 0x1ea   :  { %v401_v48 = vsel %vm399_vm1, %v400_v46, 0.0 }
 0x1ec   :  { %s461_s20 = spop %460 }
 0x1ed   :  { %v403_v45 = vstv %s461_s20 }
 0x1ee   :  { %v404_v47 = vsel %vm402_vm0, %v403_v45, 0.0 }
 0x1ef   :  { %v405_v49 = vadd.f32 %v404_v47, %v401_v48 }
 0x1f6   :  { %s463_s21 = spop %462 }
 0x1f7   :  { %v407_v50 = vstv %s463_s21 }
 0x1f8   :  { %v408_v51 = vsel %vm406_vm2, %v407_v50, 0.0 }
 0x1f9   :  { %v409_v52 = vadd.f32 %v408_v51, %v405_v49 }
 0x1fb   :  { %411 = vst [vmem:[%s683_s2] sm:$0xff] %v409_v52 }

// kernel: _lambda_.3
= control target key start
LH: loop header
LB: loop body
LE: loop exit
PB: predicated region body
PF: predicated region fallthrough
CT: control target
= control target key end

     0   :  { %v591_v1 = vmov 0   ;;  %vm129_vm0 = vcmask 523264   ;;  %s808_s1 = inlined_call_operand.vmem [shape: bf16[64,256], index: 1, kind: input, shape index: {}]   ;;  %s809_s0 = inlined_call_operand.vmem [shape: bf16[96,64], index: 0, kind: input, shape index: {}]   ;;  %s810_s2 = inlined_call_operand.vmem [shape: f32[1,8,128], index: 2, kind: output, shape index: {}]  }
   0x1   :  { %v525_v0 = vld [vmem:[%s808_s1 + $0x4] ss:$8 sps:$4 sm:$0xff]   ;;  %180 = vmatprep.mubr.bf16.mxu0 %v591_v1  ;;  %210 = vmatprep.mubr.bf16.mxu1 %v591_v1  ;;  %v527_v2 = vld [vmem:[%s808_s1] ss:$8 sps:$4 sm:$0xff]   ;;  %v528_v3 = vld [vmem:[%s808_s1 + $0x14] ss:$8 sps:$4 sm:$0xff]  }
   0x2   :  { %148 = vmatprep.subr.bf16.mxu0 %v525_v0  ;;  %509 = vmatprep.subr.bf16.mxu1 %v525_v0  ;;  %v530_v4 = vld [vmem:[%s808_s1 + $0x10] ss:$8 sps:$4 sm:$0xff]   ;;  %v531_v5 = vld [vmem:[%s808_s1 + $0x24] ss:$8 sps:$4 sm:$0xff]   ;;  %v533_v6 = vld [vmem:[%s808_s1 + $0x20] ss:$8 sps:$4 sm:$0xff]  }
   0x3   :  { %149 = vmatpush1.bf16.msra.mxu0 %v527_v2  ;;  %513 = vmatpush1.bf16.msra.mxu1 %v527_v2  ;;  %v534_v7 = vld [vmem:[%s808_s1 + $0x34] ss:$8 sps:$4 sm:$0xff]   ;;  %v536_v8 = vld [vmem:[%s808_s1 + $0x30] ss:$8 sps:$4 sm:$0xff]   ;;  %v537_v9 = vld [vmem:[%s809_s0] sm:$0xff]  }
   0x4   :  { %150 = vmatprep.subr.bf16.mxu0 %v528_v3  ;;  %510 = vmatprep.subr.bf16.mxu1 %v528_v3  ;;  %v538_v10 = vld [vmem:[%s809_s0 + $0x18] sm:$0xff]   ;;  %v539_v11 = vld [vmem:[%s809_s0 + $0x8] sm:$0xff]   ;;  %v540_v12 = vld [vmem:[%s809_s0 + $0x20] sm:$0xff]  }
   0x5   :  { %v541_v13 = vld [vmem:[%s809_s0 + $0x10] sm:$0xff]   ;;  %v542_v14 = vld [vmem:[%s809_s0 + $0x28] sm:$0xff]  }
   0x7   :  { %151 = vmatpush1.bf16.msra.mxu0 %v530_v4  ;;  %514 = vmatpush1.bf16.msra.mxu1 %v530_v4 }
   0x8   :  { %152 = vmatprep.subr.bf16.mxu0 %v531_v5  ;;  %511 = vmatprep.subr.bf16.mxu1 %v531_v5 }
   0xb   :  { %153 = vmatpush1.bf16.msra.mxu0 %v533_v6  ;;  %515 = vmatpush1.bf16.msra.mxu1 %v533_v6 }
   0xc   :  { %154 = vmatprep.subr.bf16.mxu0 %v534_v7  ;;  %512 = vmatprep.subr.bf16.mxu1 %v534_v7 }
   0xf   :  { %155 = vmatpush1.bf16.msra.mxu0 %v536_v8  ;;  %516 = vmatpush1.bf16.msra.mxu1 %v536_v8 }
  0x12   :  { %503 = vmatmul.mubr.msk.bf16.vlgmr.msra.gmra.mrb[0].mxu0 %vm129_vm0, %v537_v9  ;;  %506 = vmatmul.mubr.msk.bf16.vlgmr.msra.gmra.mrb[0].mxu1 %vm129_vm0, %v538_v10 }
  0x13   :  { %190 = vmatprep.mubr.bf16.mxu0 %v591_v1  ;;  %220 = vmatprep.mubr.bf16.mxu1 %v591_v1 }
  0x1a   :  { %504 = vmatmul.mubr.msk.bf16.gmra.mrb[4].mxu0 %vm129_vm0, %v539_v11  ;;  %507 = vmatmul.mubr.msk.bf16.gmra.mrb[4].mxu1 %vm129_vm0, %v540_v12 }
  0x1b   :  { %200 = vmatprep.mubr.bf16.mxu0 %v591_v1  ;;  %230 = vmatprep.mubr.bf16.mxu1 %v591_v1 }
  0x22   :  { %505 = vmatmul.mubr.msk.bf16.gmra.mrb[8].mxu0 %vm129_vm0, %v541_v13  ;;  %508 = vmatmul.mubr.msk.bf16.gmra.mrb[8].mxu1 %vm129_vm0, %v542_v14 }
  0xe5   :  { %v182_v15 = vpop.f32.mrb[0].mxu0  ;;  %v212_v16 = vpop.f32.mrb[0].mxu1 }
  0xe6   :  { %v241_v17 = vmul.f32 %v182_v15, %v182_v15  ;;  %v253_v18 = vmul.f32 %v212_v16, %v212_v16  ;;  %v184_v19 = vpop.f32.mrb[1].mxu0  ;;  %v214_v20 = vpop.f32.mrb[1].mxu1 }
  0xe7   :  { %v242_v21 = vmul.f32 %v184_v19, %v184_v19  ;;  %v254_v22 = vmul.f32 %v214_v20, %v214_v20  ;;  %v186_v23 = vpop.f32.mrb[2].mxu0  ;;  %v216_v24 = vpop.f32.mrb[2].mxu1 }
  0xe8   :  { %v243_v25 = vmul.f32 %v186_v23, %v186_v23  ;;  %v255_v26 = vmul.f32 %v216_v24, %v216_v24  ;;  %v188_v27 = vpop.f32.mrb[3].mxu0  ;;  %v218_v28 = vpop.f32.mrb[3].mxu1 }
  0xe9   :  { %v265_v29 = vadd.f32 %v242_v21, %v241_v17  ;;  %v271_v30 = vadd.f32 %v254_v22, %v253_v18  ;;  %v244_v31 = vmul.f32 %v188_v27, %v188_v27  ;;  %v256_v32 = vmul.f32 %v218_v28, %v218_v28 }
  0xeb   :  { %v649_v33 = vmax.f32 %v265_v29, 1e-07  ;;  %v651_v34 = vmax.f32 %v271_v30, 1e-07  ;;  %v266_v35 = vadd.f32 %v244_v31, %v243_v25  ;;  %v272_v36 = vadd.f32 %v256_v32, %v255_v26 }
  0xed   :  { %543 = vrsqrt.f32 %v649_v33  ;;  %v654_v37 = vmax.f32 %v266_v35, 1e-07  ;;  %v656_v38 = vmax.f32 %v272_v36, 1e-07  ;;  %v192_v39 = vpop.f32.mrb[4].mxu0  ;;  %v222_v40 = vpop.f32.mrb[4].mxu1 }
  0xee   :  { %545 = vrsqrt.f32 %v651_v34  ;;  %v245_v41 = vmul.f32 %v192_v39, %v192_v39  ;;  %v257_v42 = vmul.f32 %v222_v40, %v222_v40  ;;  %v194_v43 = vpop.f32.mrb[5].mxu0  ;;  %v224_v44 = vpop.f32.mrb[5].mxu1  ;;  %vm291_vm1 = vcmp.eq.f32.partialorder %v649_v33, inf }
  0xef   :  { %547 = vrsqrt.f32 %v654_v37  ;;  %v246_v45 = vmul.f32 %v194_v43, %v194_v43  ;;  %v258_v46 = vmul.f32 %v224_v44, %v224_v44  ;;  %v196_v47 = vpop.f32.mrb[6].mxu0  ;;  %v226_v48 = vpop.f32.mrb[6].mxu1  ;;  %v668_v63 = vadd.f32 %v656_v38, %v651_v34 }
  0xf0   :  { %549 = vrsqrt.f32 %v656_v38  ;;  %v247_v49 = vmul.f32 %v196_v47, %v196_v47  ;;  %v259_v50 = vmul.f32 %v226_v48, %v226_v48  ;;  %v198_v51 = vpop.f32.mrb[7].mxu0  ;;  %v228_v52 = vpop.f32.mrb[7].mxu1  ;;  %v294_v9 = vand.u32 2147483648, %v649_v33 }
  0xf1   :  { %v267_v53 = vadd.f32 %v246_v45, %v245_v41  ;;  %v273_v54 = vadd.f32 %v258_v46, %v257_v42  ;;  %v248_v55 = vmul.f32 %v198_v51, %v198_v51  ;;  %v260_v56 = vmul.f32 %v228_v52, %v228_v52 }
  0xf2   :  { %vm293_vm2 = vcmp.eq.f32.partialorder %v649_v33, 0.0  ;;  %vm298_vm3 = vcmp.eq.f32.partialorder %v654_v37, inf  ;;  %v301_v15 = vand.u32 2147483648, %v654_v37  ;;  %vm300_vm4 = vcmp.eq.f32.partialorder %v654_v37, 0.0 }
  0xf3   :  { %v661_v57 = vmax.f32 %v267_v53, 1e-07  ;;  %v268_v58 = vadd.f32 %v248_v55, %v247_v49  ;;  %v274_v59 = vadd.f32 %v260_v56, %v259_v50  ;;  %v677_v22 = vmax.f32 %v273_v54, 1e-07 }
  0xf4   :  { %vm333_vm5 = vcmp.eq.f32.partialorder %v651_v34, inf  ;;  %vm335_vm6 = vcmp.eq.f32.partialorder %v651_v34, 0.0  ;;  %v336_v29 = vand.u32 2147483648, %v651_v34  ;;  %vm340_vm7 = vcmp.eq.f32.partialorder %v656_v38, inf }
  0xf5   :  { %551 = vrsqrt.f32 %v661_v57  ;;  %v664_v60 = vmax.f32 %v268_v58, 1e-07  ;;  %v202_v61 = vpop.f32.mrb[8].mxu0  ;;  %v232_v62 = vpop.f32.mrb[8].mxu1  ;;  %v689_v31 = vmax.f32 %v274_v59, 1e-07 }
  0xf6   :  { %v249_v0 = vmul.f32 %v202_v61, %v202_v61  ;;  %v261_v1 = vmul.f32 %v232_v62, %v232_v62  ;;  %v204_v2 = vpop.f32.mrb[9].mxu0  ;;  %v234_v3 = vpop.f32.mrb[9].mxu1  ;;  %vm342_vm8 = vcmp.eq.f32.partialorder %v656_v38, 0.0  ;;  %vm305_vm9 = vcmp.eq.f32.partialorder %v661_v57, inf }
  0xf7   :  { %v544_v4 = vpop.eup %543  ;;  %553 = vrsqrt.f32 %v664_v60  ;;  %v250_v5 = vmul.f32 %v204_v2, %v204_v2  ;;  %v262_v6 = vmul.f32 %v234_v3, %v234_v3  ;;  %v206_v7 = vpop.f32.mrb[10].mxu0  ;;  %vm307_vm10 = vcmp.eq.f32.partialorder %v661_v57, 0.0 }
  0xf8   :  { %v236_v8 = vpop.f32.mrb[10].mxu1  ;;  %v546_v10 = vpop.eup %545  ;;  %v251_v11 = vmul.f32 %v206_v7, %v206_v7  ;;  %v290_v23 = vmul.f32 %v544_v4, %v649_v33  ;;  %v308_v36 = vand.u32 2147483648, %v661_v57  ;;  %vm312_vm11 = vcmp.eq.f32.partialorder %v664_v60, inf }
  0xf9   :  { %v263_v12 = vmul.f32 %v236_v8, %v236_v8  ;;  %v208_v13 = vpop.f32.mrb[11].mxu0  ;;  %v238_v14 = vpop.f32.mrb[11].mxu1  ;;  %v269_v17 = vadd.f32 %v250_v5, %v249_v0  ;;  %v275_v18 = vadd.f32 %v262_v6, %v261_v1  ;;  %v332_v28 = vmul.f32 %v546_v10, %v651_v34 }
  0xfa   :  { %v548_v16 = vpop.eup %547  ;;  %v252_v19 = vmul.f32 %v208_v13, %v208_v13  ;;  %v264_v20 = vmul.f32 %v238_v14, %v238_v14  ;;  %v292_v35 = vsel %vm291_vm1, %v649_v33, %v290_v23  ;;  %v315_v41 = vand.u32 2147483648, %v664_v60 }
  0xfb   :  { %v550_v21 = vpop.eup %549  ;;  %v682_v24 = vmax.f32 %v269_v17, 1e-07  ;;  %v297_v27 = vmul.f32 %v548_v16, %v654_v37  ;;  %v707_v42 = vmax.f32 %v275_v18, 1e-07  ;;  %vm314_vm12 = vcmp.eq.f32.partialorder %v664_v60, 0.0 }
  0xfc   :  { %v270_v25 = vadd.f32 %v252_v19, %v251_v11  ;;  %v276_v26 = vadd.f32 %v264_v20, %v263_v12  ;;  %v339_v30 = vmul.f32 %v550_v21, %v656_v38  ;;  %v334_v44 = vsel %vm333_vm5, %v651_v34, %v332_v28 }
  0xfd   :  { %555 = vrsqrt.f32 %v682_v24  ;;  %v299_v40 = vsel %vm298_vm3, %v654_v37, %v297_v27  ;;  %v295_v48 = vsel %vm293_vm2, %v294_v9, %v292_v35  ;;  %v343_v49 = vand.u32 2147483648, %v656_v38 }
  0xfe   :  { %v692_v32 = vmax.f32 %v270_v25, 1e-07  ;;  %v341_v45 = vsel %vm340_vm7, %v656_v38, %v339_v30  ;;  %v717_v47 = vmax.f32 %v276_v26, 1e-07  ;;  %v302_v50 = vsel %vm300_vm4, %v301_v15, %v299_v40 }
  0xff   :  { %v552_v39 = vpop.eup %551  ;;  %vm319_vm13 = vcmp.eq.f32.partialorder %v682_v24, inf  ;;  %vm321_vm14 = vcmp.eq.f32.partialorder %v682_v24, 0.0  ;;  %v337_v33 = vsel %vm335_vm6, %v336_v29, %v334_v44  ;;  %v344_v53 = vsel %vm342_vm8, %v343_v49, %v341_v45 }
 0x100   :  { %557 = vrsqrt.f32 %v692_v32  ;;  %v304_v43 = vmul.f32 %v552_v39, %v661_v57  ;;  %v322_v37 = vand.u32 2147483648, %v682_v24  ;;  %vm326_vm15 = vcmp.eq.f32.partialorder %v692_v32, inf }
 0x101   :  { %v554_v46 = vpop.eup %553  ;;  %559 = vrsqrt.f32 %v677_v22  ;;  %vm328_vm0 = vcmp.eq.f32.partialorder %v692_v32, 0.0  ;;  %v329_v54 = vand.u32 2147483648, %v692_v32  ;;  %vm347_vm1 = vcmp.eq.f32.partialorder %v677_v22, inf }
 0x102   :  { %v311_v51 = vmul.f32 %v554_v46, %v664_v60  ;;  %561 = vrsqrt.f32 %v689_v31  ;;  %v306_v52 = vsel %vm305_vm9, %v661_v57, %v304_v43  ;;  %v350_v55 = vand.u32 2147483648, %v677_v22 }
 0x103   :  { %563 = vrsqrt.f32 %v707_v42  ;;  %v309_v34 = vsel %vm307_vm10, %v308_v36, %v306_v52  ;;  %vm349_vm2 = vcmp.eq.f32.partialorder %v677_v22, 0.0  ;;  %v373_v56 = vsub.f32 %v337_v33, %v295_v48 }
 0x104   :  { %565 = vrsqrt.f32 %v717_v47  ;;  %v313_v38 = vsel %vm312_vm11, %v664_v60, %v311_v51  ;;  %v374_v58 = vsub.f32 %v344_v53, %v302_v50  ;;  %vm354_vm3 = vcmp.eq.f32.partialorder %v689_v31, inf }
 0x105   :  { %vm356_vm4 = vcmp.eq.f32.partialorder %v689_v31, 0.0  ;;  %567 = vlog2.f32 %v337_v33  ;;  %v400_v61 = vadd.f32 %v668_v63, %v677_v22  ;;  %v379_v62 = vmul.f32 %v373_v56, %v373_v56 }
 0x106   :  { %v380_v0 = vmul.f32 %v374_v58, %v374_v58  ;;  %569 = vlog2.f32 %v344_v53  ;;  %v316_v2 = vsel %vm314_vm12, %v315_v41, %v313_v38  ;;  %v357_v3 = vand.u32 2147483648, %v689_v31 }
 0x107   :  { %v556_v59 = vpop.eup %555  ;;  %571 = vlog2.f32 %v295_v48  ;;  %v401_v4 = vadd.f32 %v400_v61, %v689_v31  ;;  %vm361_vm5 = vcmp.eq.f32.partialorder %v707_v42, inf  ;;  %vm363_vm6 = vcmp.eq.f32.partialorder %v707_v42, 0.0 }
 0x108   :  { %v318_v57 = vmul.f32 %v556_v59, %v682_v24  ;;  %v385_v6 = vadd.f32 %v380_v0, %v379_v62  ;;  %573 = vlog2.f32 %v302_v50  ;;  %v364_v12 = vand.u32 2147483648, %v707_v42 }
 0x109   :  { %v402_v60 = vadd.f32 %v401_v4, %v707_v42  ;;  %575 = vlog2.f32 %v309_v34  ;;  %vm368_vm7 = vcmp.eq.f32.partialorder %v717_v47, inf  ;;  %vm370_vm8 = vcmp.eq.f32.partialorder %v717_v47, 0.0 }
 0x10a   :  { %v558_v1 = vpop.eup %557  ;;  %v320_v5 = vsel %vm319_vm13, %v682_v24, %v318_v57  ;;  %577 = vlog2.f32 %v316_v2  ;;  %v371_v27 = vand.u32 2147483648, %v717_v47 }
 0x10b   :  { %v325_v63 = vmul.f32 %v558_v1, %v692_v32  ;;  %v560_v7 = vpop.eup %559  ;;  %v323_v8 = vsel %vm321_vm14, %v322_v37, %v320_v5  ;;  %v777_v15 = vadd.f32 %v402_v60, %v717_v47 }
 0x10c   :  { %v562_v9 = vpop.eup %561  ;;  %v346_v11 = vmul.f32 %v560_v7, %v677_v22  ;;  %579 = vlog2.f32 %v323_v8 }
 0x10d   :  { %v327_v10 = vsel %vm326_vm15, %v692_v32, %v325_v63  ;;  %v353_v14 = vmul.f32 %v562_v9, %v689_v31  ;;  %v564_v16 = vpop.eup %563 }
 0x10e   :  { %v330_v13 = vsel %vm328_vm0, %v329_v54, %v327_v10  ;;  %v348_v17 = vsel %vm347_vm1, %v677_v22, %v346_v11  ;;  %v566_v18 = vpop.eup %565  ;;  %v360_v21 = vmul.f32 %v564_v16, %v707_v42 }
 0x10f   :  { %v351_v19 = vsel %vm349_vm2, %v350_v55, %v348_v17  ;;  %v355_v20 = vsel %vm354_vm3, %v689_v31, %v353_v14  ;;  %581 = vlog2.f32 %v330_v13  ;;  %v367_v24 = vmul.f32 %v566_v18, %v717_v47  ;;  %v568_v26 = vpop.eup %567 }
 0x110   :  { %v358_v23 = vsel %vm356_vm4, %v357_v3, %v355_v20  ;;  %v375_v25 = vsub.f32 %v351_v19, %v309_v34  ;;  %583 = vlog2.f32 %v351_v19  ;;  %v362_v22 = vsel %vm361_vm5, %v707_v42, %v360_v21  ;;  %v570_v29 = vpop.eup %569 }
 0x111   :  { %v376_v28 = vsub.f32 %v358_v23, %v316_v2  ;;  %585 = vlog2.f32 %v358_v23  ;;  %v365_v30 = vsel %vm363_vm6, %v364_v12, %v362_v22  ;;  %v369_v31 = vsel %vm368_vm7, %v717_v47, %v367_v24  ;;  %v572_v36 = vpop.eup %571 }
 0x112   :  { %v381_v32 = vmul.f32 %v375_v25, %v375_v25  ;;  %v414_v35 = vmul.f32 0.6931472, %v568_v26  ;;  %v372_v39 = vsel %vm370_vm8, %v371_v27, %v369_v31  ;;  %v377_v40 = vsub.f32 %v365_v30, %v323_v8  ;;  %v574_v43 = vpop.eup %573 }
 0x113   :  { %v382_v41 = vmul.f32 %v376_v28, %v376_v28  ;;  %587 = vlog2.f32 %v365_v30  ;;  %v378_v44 = vsub.f32 %v372_v39, %v330_v13  ;;  %v416_v46 = vmul.f32 0.6931472, %v570_v29  ;;  %v576_v50 = vpop.eup %575 }
 0x114   :  { %v386_v45 = vadd.f32 %v385_v6, %v381_v32  ;;  %589 = vlog2.f32 %v372_v39  ;;  %v383_v42 = vmul.f32 %v377_v40, %v377_v40  ;;  %v426_v48 = vmul.f32 0.6931472, %v572_v36  ;;  %v578_v33 = vpop.eup %577 }
 0x115   :  { %v428_v49 = vmul.f32 0.6931472, %v574_v43  ;;  %v384_v51 = vmul.f32 %v378_v44, %v378_v44  ;;  %v430_v34 = vmul.f32 0.6931472, %v576_v50  ;;  %v432_v61 = vmul.f32 0.6931472, %v578_v33 }
 0x116   :  { %v387_v52 = vadd.f32 %v386_v45, %v382_v41  ;;  %v437_v53 = vsub.f32 %v414_v35, %v426_v48  ;;  %v580_v54 = vpop.eup %579  ;;  %v463_v44 = vlaneseq }
 0x117   :  { %v438_v37 = vsub.f32 %v416_v46, %v428_v49  ;;  %v434_v2 = vmul.f32 0.6931472, %v580_v54 }
 0x118   :  { %v388_v47 = vadd.f32 %v387_v52, %v383_v42  ;;  %v443_v38 = vand.u32 2147483647, %v437_v53  ;;  %v464_v45 = vand.u32 127, %v463_v44 }
 0x119   :  { %v582_v55 = vpop.eup %581  ;;  %v444_v56 = vand.u32 2147483647, %v438_v37 }
 0x11a   :  { %v584_v58 = vpop.eup %583  ;;  %v389_v59 = vadd.f32 %v388_v47, %v384_v51  ;;  %v436_v4 = vmul.f32 0.6931472, %v582_v55  ;;  %vm469_vm9 = vcmp.eq.s32.totalorder %v464_v45, 1  ;;  %vm466_vm10 = vcmp.eq.s32.totalorder %v464_v45, 0 }
 0x11b   :  { %v586_v57 = vpop.eup %585  ;;  %v418_v62 = vmul.f32 0.6931472, %v584_v58  ;;  %v449_v0 = vadd.f32 %v444_v56, %v443_v38  ;;  %vm473_vm11 = vcmp.eq.s32.totalorder %v464_v45, 2 }
 0x11c   :  { %390 = vadd.xlane.f32.xlu0 %v389_v59  ;;  %v420_v1 = vmul.f32 0.6931472, %v586_v57 }
 0x11d   :  { %v588_v3 = vpop.eup %587  ;;  %v439_v5 = vsub.f32 %v418_v62, %v430_v34 }
 0x11e   :  { %v590_v63 = vpop.eup %589  ;;  %v422_v6 = vmul.f32 0.6931472, %v588_v3  ;;  %v440_v7 = vsub.f32 %v420_v1, %v432_v61 }
 0x11f   :  { %v424_v8 = vmul.f32 0.6931472, %v590_v63  ;;  %v445_v60 = vand.u32 2147483647, %v439_v5 }
 0x120   :  { %404 = vadd.xlane.f32.xlu0 %v777_v15  ;;  %v441_v9 = vsub.f32 %v422_v6, %v434_v2  ;;  %v446_v10 = vand.u32 2147483647, %v440_v7 }
 0x121   :  { %v442_v11 = vsub.f32 %v424_v8, %v436_v4  ;;  %v450_v12 = vadd.f32 %v449_v0, %v445_v60 }
 0x122   :  { %v447_v13 = vand.u32 2147483647, %v441_v9 }
 0x123   :  { %v448_v14 = vand.u32 2147483647, %v442_v11  ;;  %v451_v16 = vadd.f32 %v450_v12, %v446_v10 }
 0x125   :  { %v452_v17 = vadd.f32 %v451_v16, %v447_v13 }
 0x127   :  { %v453_v18 = vadd.f32 %v452_v17, %v448_v14 }
 0x129   :  { %454 = vadd.xlane.f32.xlu1 %v453_v18 }
 0x1a9   :  { %v391_v19 = vpop.xlane.xlu0 %390 }
 0x1aa   :  { %v392_v20 = vrot.slane %v391_v19, 4 }
 0x1ac   :  { %v393_v21 = vadd.f32 %v392_v20, %v391_v19 }
 0x1ad   :  { %v405_v23 = vpop.xlane.xlu0 %404 }
 0x1ae   :  { %v394_v24 = vrot.slane %v393_v21, 2  ;;  %v406_v25 = vrot.slane %v405_v23, 4 }
 0x1b0   :  { %v407_v26 = vadd.f32 %v406_v25, %v405_v23  ;;  %v395_v22 = vadd.f32 %v394_v24, %v393_v21 }
 0x1b2   :  { %v408_v27 = vrot.slane %v407_v26, 2  ;;  %v396_v15 = vrot.slane %v395_v22, 1 }
 0x1b4   :  { %v409_v28 = vadd.f32 %v408_v27, %v407_v26  ;;  %v397_v29 = vadd.f32 %v396_v15, %v395_v22 }
 0x1b6   :  { %v455_v30 = vpop.xlane.xlu1 %454  ;;  %517 = vpush %v397_v29  ;;  %v410_v31 = vrot.slane %v409_v28, 1 }
 0x1b7   :  { %v456_v32 = vrot.slane %v455_v30, 4 }
 0x1b8   :  { %v411_v35 = vadd.f32 %v410_v31, %v409_v28 }
 0x1b9   :  { %v457_v36 = vadd.f32 %v456_v32, %v455_v30 }
 0x1ba   :  { %519 = vpush %v411_v35 }
 0x1bb   :  { %v458_v39 = vrot.slane %v457_v36, 2 }
 0x1bd   :  { %v459_v40 = vadd.f32 %v458_v39, %v457_v36 }
 0x1bf   :  { %v460_v41 = vrot.slane %v459_v40, 1 }
 0x1c1   :  { %v461_v43 = vadd.f32 %v460_v41, %v459_v40 }
 0x1c3   :  { %521 = vpush %v461_v43 }
 0x1e7   :  { %s518_s0 = spop %517 }
 0x1e8   :  { %v467_v42 = vstv %s518_s0 }
 0x1e9   :  { %v468_v49 = vsel %vm466_vm10, %v467_v42, 0.0 }
 0x1eb   :  { %s520_s8 = spop %519 }
 0x1ec   :  { %v470_v46 = vstv %s520_s8 }
 0x1ed   :  { %v471_v48 = vsel %vm469_vm9, %v470_v46, 0.0 }
 0x1ee   :  { %v472_v50 = vadd.f32 %v471_v48, %v468_v49 }
 0x1f4   :  { %s522_s9 = spop %521 }
 0x1f5   :  { %v474_v51 = vstv %s522_s9 }
 0x1f6   :  { %v475_v52 = vsel %vm473_vm11, %v474_v51, 0.0 }
 0x1f7   :  { %v476_v33 = vadd.f32 %v475_v52, %v472_v50 }
 0x1f9   :  { %478 = vst [vmem:[%s810_s2] sm:$0xff] %v476_v33 }

// kernel: _lambda_.5
= control target key start
LH: loop header
LB: loop body
LE: loop exit
PB: predicated region body
PF: predicated region fallthrough
CT: control target
= control target key end

     0   :  { %v809_v1 = vmov 0   ;;  %vm133_vm0 = vcmask 261120   ;;  %s1170_s1 = inlined_call_operand.vmem [shape: bf16[32,256], index: 1, kind: input, shape index: {}]   ;;  %s1171_s0 = inlined_call_operand.vmem [shape: bf16[160,32], index: 0, kind: input, shape index: {}]   ;;  %s1172_s2 = inlined_call_operand.vmem [shape: f32[1,8,128], index: 2, kind: output, shape index: {}]  }
   0x1   :  { %v713_v0 = vld [vmem:[%s1170_s1 + $0x4] ss:$8 sps:$4 sm:$0xff]   ;;  %196 = vmatprep.mubr.bf16.mxu0 %v809_v1  ;;  %246 = vmatprep.mubr.bf16.mxu1 %v809_v1  ;;  %v715_v2 = vld [vmem:[%s1170_s1] ss:$8 sps:$4 sm:$0xff]   ;;  %v716_v3 = vld [vmem:[%s1170_s1 + $0x14] ss:$8 sps:$4 sm:$0xff]  }
   0x2   :  { %164 = vmatprep.subr.bf16.mxu0 %v713_v0  ;;  %701 = vmatprep.subr.bf16.mxu1 %v713_v0  ;;  %v718_v4 = vld [vmem:[%s1170_s1 + $0x10] ss:$8 sps:$4 sm:$0xff]   ;;  %v719_v5 = vld [vmem:[%s1171_s0] sm:$0xff]   ;;  %v720_v6 = vld [vmem:[%s1171_s0 + $0x28] sm:$0xff]  }
   0x3   :  { %165 = vmatpush1.bf16.msra.mxu0 %v715_v2  ;;  %703 = vmatpush1.bf16.msra.mxu1 %v715_v2  ;;  %v721_v7 = vld [vmem:[%s1171_s0 + $0x8] sm:$0xff]   ;;  %v722_v8 = vld [vmem:[%s1171_s0 + $0x30] sm:$0xff]   ;;  %v724_v10 = vld [vmem:[%s1171_s0 + $0x38] sm:$0xff]  }
   0x4   :  { %166 = vmatprep.subr.bf16.mxu0 %v716_v3  ;;  %702 = vmatprep.subr.bf16.mxu1 %v716_v3  ;;  %v723_v9 = vld [vmem:[%s1171_s0 + $0x10] sm:$0xff]   ;;  %v725_v11 = vld [vmem:[%s1171_s0 + $0x18] sm:$0xff]   ;;  %v726_v12 = vld [vmem:[%s1171_s0 + $0x40] sm:$0xff]  }
   0x5   :  { %v727_v13 = vld [vmem:[%s1171_s0 + $0x20] sm:$0xff]   ;;  %v728_v14 = vld [vmem:[%s1171_s0 + $0x48] sm:$0xff]  }
   0x7   :  { %167 = vmatpush1.bf16.msra.mxu0 %v718_v4  ;;  %704 = vmatpush1.bf16.msra.mxu1 %v718_v4 }
   0xa   :  { %691 = vmatmul.mubr.msk.bf16.vlgmr.msra.gmra.mrb[0].mxu0 %vm133_vm0, %v719_v5  ;;  %696 = vmatmul.mubr.msk.bf16.vlgmr.msra.gmra.mrb[0].mxu1 %vm133_vm0, %v720_v6 }
   0xb   :  { %206 = vmatprep.mubr.bf16.mxu0 %v809_v1  ;;  %256 = vmatprep.mubr.bf16.mxu1 %v809_v1 }
  0x12   :  { %692 = vmatmul.mubr.msk.bf16.gmra.mrb[4].mxu0 %vm133_vm0, %v721_v7  ;;  %697 = vmatmul.mubr.msk.bf16.gmra.mrb[4].mxu1 %vm133_vm0, %v722_v8 }
  0x13   :  { %216 = vmatprep.mubr.bf16.mxu0 %v809_v1  ;;  %266 = vmatprep.mubr.bf16.mxu1 %v809_v1 }
  0x1a   :  { %693 = vmatmul.mubr.msk.bf16.gmra.mrb[8].mxu0 %vm133_vm0, %v723_v9  ;;  %698 = vmatmul.mubr.msk.bf16.gmra.mrb[8].mxu1 %vm133_vm0, %v724_v10 }
  0x1b   :  { %226 = vmatprep.mubr.bf16.mxu0 %v809_v1  ;;  %276 = vmatprep.mubr.bf16.mxu1 %v809_v1 }
  0x22   :  { %694 = vmatmul.mubr.msk.bf16.gmra.mrb[12].mxu0 %vm133_vm0, %v725_v11  ;;  %699 = vmatmul.mubr.msk.bf16.gmra.mrb[12].mxu1 %vm133_vm0, %v726_v12 }
  0x23   :  { %236 = vmatprep.mubr.bf16.mxu0 %v809_v1  ;;  %286 = vmatprep.mubr.bf16.mxu1 %v809_v1 }
  0x2a   :  { %695 = vmatmul.mubr.msk.bf16.gmra.mrb[16].mxu0 %vm133_vm0, %v727_v13  ;;  %700 = vmatmul.mubr.msk.bf16.gmra.mrb[16].mxu1 %vm133_vm0, %v728_v14 }
  0xdd   :  { %v198_v15 = vpop.f32.mrb[0].mxu0  ;;  %v248_v16 = vpop.f32.mrb[0].mxu1 }
  0xde   :  { %v297_v17 = vmul.f32 %v198_v15, %v198_v15  ;;  %v317_v18 = vmul.f32 %v248_v16, %v248_v16  ;;  %v200_v19 = vpop.f32.mrb[1].mxu0  ;;  %v250_v20 = vpop.f32.mrb[1].mxu1 }
  0xdf   :  { %v298_v21 = vmul.f32 %v200_v19, %v200_v19  ;;  %v318_v22 = vmul.f32 %v250_v20, %v250_v20  ;;  %v202_v23 = vpop.f32.mrb[2].mxu0  ;;  %v252_v24 = vpop.f32.mrb[2].mxu1 }
  0xe0   :  { %v299_v25 = vmul.f32 %v202_v23, %v202_v23  ;;  %v319_v26 = vmul.f32 %v252_v24, %v252_v24  ;;  %v204_v27 = vpop.f32.mrb[3].mxu0  ;;  %v254_v28 = vpop.f32.mrb[3].mxu1 }
  0xe1   :  { %v337_v29 = vadd.f32 %v298_v21, %v297_v17  ;;  %v347_v30 = vadd.f32 %v318_v22, %v317_v18  ;;  %v300_v31 = vmul.f32 %v204_v27, %v204_v27  ;;  %v320_v32 = vmul.f32 %v254_v28, %v254_v28 }
  0xe3   :  { %v877_v33 = vmax.f32 %v337_v29, 1e-07  ;;  %v338_v34 = vadd.f32 %v300_v31, %v299_v25  ;;  %v348_v35 = vadd.f32 %v320_v32, %v319_v26  ;;  %v885_v56 = vmax.f32 %v347_v30, 1e-07 }
  0xe5   :  { %v208_v36 = vpop.f32.mrb[4].mxu0  ;;  %v258_v37 = vpop.f32.mrb[4].mxu1  ;;  %729 = vrsqrt.f32 %v877_v33  ;;  %v880_v41 = vmax.f32 %v338_v34, 1e-07  ;;  %v891_v7 = vmax.f32 %v348_v35, 1e-07 }
  0xe6   :  { %v301_v38 = vmul.f32 %v208_v36, %v208_v36  ;;  %v210_v39 = vpop.f32.mrb[5].mxu0  ;;  %v260_v40 = vpop.f32.mrb[5].mxu1  ;;  %v321_v42 = vmul.f32 %v258_v37, %v258_v37  ;;  %vm379_vm1 = vcmp.eq.f32.partialorder %v877_v33, inf  ;;  %vm381_vm2 = vcmp.eq.f32.partialorder %v877_v33, 0.0 }
  0xe7   :  { %v302_v43 = vmul.f32 %v210_v39, %v210_v39  ;;  %v322_v44 = vmul.f32 %v260_v40, %v260_v40  ;;  %v212_v45 = vpop.f32.mrb[6].mxu0  ;;  %v262_v46 = vpop.f32.mrb[6].mxu1  ;;  %731 = vrsqrt.f32 %v880_v41  ;;  %v382_v17 = vand.u32 2147483648, %v877_v33 }
  0xe8   :  { %v214_v47 = vpop.f32.mrb[7].mxu0  ;;  %v264_v48 = vpop.f32.mrb[7].mxu1  ;;  %v303_v51 = vmul.f32 %v212_v45, %v212_v45  ;;  %v323_v52 = vmul.f32 %v262_v46, %v262_v46  ;;  %vm386_vm3 = vcmp.eq.f32.partialorder %v880_v41, inf  ;;  %v389_v21 = vand.u32 2147483648, %v880_v41 }
  0xe9   :  { %v339_v49 = vadd.f32 %v302_v43, %v301_v38  ;;  %v349_v50 = vadd.f32 %v322_v44, %v321_v42  ;;  %v304_v53 = vmul.f32 %v214_v47, %v214_v47  ;;  %v324_v54 = vmul.f32 %v264_v48, %v264_v48 }
  0xea   :  { %v452_v27 = vand.u32 2147483648, %v885_v56  ;;  %v459_v28 = vand.u32 2147483648, %v891_v7  ;;  %vm388_vm4 = vcmp.eq.f32.partialorder %v880_v41, 0.0  ;;  %vm449_vm10 = vcmp.eq.f32.partialorder %v885_v56, inf }
  0xeb   :  { %v883_v55 = vmax.f32 %v339_v49, 1e-07  ;;  %v340_v57 = vadd.f32 %v304_v53, %v303_v51  ;;  %v350_v58 = vadd.f32 %v324_v54, %v323_v52  ;;  %v896_v15 = vmax.f32 %v349_v50, 1e-07 }
  0xec   :  { %vm456_vm12 = vcmp.eq.f32.partialorder %v891_v7, inf  ;;  %vm451_vm14 = vcmp.eq.f32.partialorder %v885_v56, 0.0 }
  0xed   :  { %v218_v59 = vpop.f32.mrb[8].mxu0  ;;  %v268_v60 = vpop.f32.mrb[8].mxu1  ;;  %v887_v61 = vmax.f32 %v340_v57, 1e-07  ;;  %733 = vrsqrt.f32 %v883_v55  ;;  %v912_v29 = vmax.f32 %v350_v58, 1e-07 }
  0xee   :  { %v305_v62 = vmul.f32 %v218_v59, %v218_v59  ;;  %v220_v63 = vpop.f32.mrb[9].mxu0  ;;  %v270_v0 = vpop.f32.mrb[9].mxu1  ;;  %v325_v1 = vmul.f32 %v268_v60, %v268_v60  ;;  %735 = vrsqrt.f32 %v885_v56  ;;  %vm393_vm5 = vcmp.eq.f32.partialorder %v883_v55, inf }
  0xef   :  { %v306_v2 = vmul.f32 %v220_v63, %v220_v63  ;;  %v326_v3 = vmul.f32 %v270_v0, %v270_v0  ;;  %v222_v4 = vpop.f32.mrb[10].mxu0  ;;  %v272_v5 = vpop.f32.mrb[10].mxu1  ;;  %737 = vrsqrt.f32 %v887_v61  ;;  %v396_v52 = vand.u32 2147483648, %v883_v55 }
  0xf0   :  { %v730_v6 = vpop.eup %729  ;;  %v307_v8 = vmul.f32 %v222_v4, %v222_v4  ;;  %v327_v9 = vmul.f32 %v272_v5, %v272_v5  ;;  %v224_v10 = vpop.f32.mrb[11].mxu0  ;;  %739 = vrsqrt.f32 %v891_v7  ;;  %vm400_vm6 = vcmp.eq.f32.partialorder %v887_v61, inf }
  0xf1   :  { %v274_v11 = vpop.f32.mrb[11].mxu1  ;;  %v341_v12 = vadd.f32 %v306_v2, %v305_v62  ;;  %v351_v13 = vadd.f32 %v326_v3, %v325_v1  ;;  %v308_v14 = vmul.f32 %v224_v10, %v224_v10  ;;  %v378_v20 = vmul.f32 %v730_v6, %v877_v33  ;;  %v732_v23 = vpop.eup %731 }
  0xf2   :  { %v328_v16 = vmul.f32 %v274_v11, %v274_v11  ;;  %v385_v40 = vmul.f32 %v732_v23, %v880_v41  ;;  %vm395_vm7 = vcmp.eq.f32.partialorder %v883_v55, 0.0  ;;  %v403_v60 = vand.u32 2147483648, %v887_v61 }
  0xf3   :  { %v900_v18 = vmax.f32 %v341_v12, 1e-07  ;;  %v342_v19 = vadd.f32 %v308_v14, %v307_v8  ;;  %v380_v39 = vsel %vm379_vm1, %v877_v33, %v378_v20  ;;  %v924_v53 = vmax.f32 %v351_v13, 1e-07 }
  0xf4   :  { %v352_v22 = vadd.f32 %v328_v16, %v327_v9  ;;  %v931_v59 = vsel %vm381_vm2, %v382_v17, %v380_v39  ;;  %v387_v62 = vsel %vm386_vm3, %v880_v41, %v385_v40  ;;  %vm402_vm8 = vcmp.eq.f32.partialorder %v887_v61, 0.0 }
  0xf5   :  { %741 = vrsqrt.f32 %v900_v18  ;;  %v906_v24 = vmax.f32 %v342_v19, 1e-07  ;;  %v228_v25 = vpop.f32.mrb[12].mxu0  ;;  %v278_v26 = vpop.f32.mrb[12].mxu1  ;;  %vm407_vm9 = vcmp.eq.f32.partialorder %v900_v18, inf  ;;  %v956_v19 = vsel %vm388_vm4, %v389_v21, %v387_v62 }
  0xf6   :  { %743 = vrsqrt.f32 %v896_v15  ;;  %v309_v30 = vmul.f32 %v228_v25, %v228_v25  ;;  %v329_v31 = vmul.f32 %v278_v26, %v278_v26  ;;  %v230_v32 = vpop.f32.mrb[13].mxu0  ;;  %v280_v34 = vpop.f32.mrb[13].mxu1  ;;  %v939_v0 = vmax.f32 %v352_v22, 1e-07 }
  0xf7   :  { %745 = vrsqrt.f32 %v906_v24  ;;  %v310_v35 = vmul.f32 %v230_v32, %v230_v32  ;;  %v330_v36 = vmul.f32 %v280_v34, %v280_v34  ;;  %v232_v37 = vpop.f32.mrb[14].mxu0  ;;  %v282_v38 = vpop.f32.mrb[14].mxu1  ;;  %vm409_vm11 = vcmp.eq.f32.partialorder %v900_v18, 0.0 }
  0xf8   :  { %v311_v42 = vmul.f32 %v232_v37, %v232_v37  ;;  %v331_v43 = vmul.f32 %v282_v38, %v282_v38  ;;  %v234_v44 = vpop.f32.mrb[15].mxu0  ;;  %v284_v45 = vpop.f32.mrb[15].mxu1  ;;  %747 = vrsqrt.f32 %v912_v29  ;;  %v410_v37 = vand.u32 2147483648, %v900_v18 }
  0xf9   :  { %v734_v46 = vpop.eup %733  ;;  %v343_v47 = vadd.f32 %v310_v35, %v309_v30  ;;  %v920_v48 = vadd.f32 %v330_v36, %v329_v31  ;;  %v312_v49 = vmul.f32 %v234_v44, %v234_v44  ;;  %v332_v50 = vmul.f32 %v284_v45, %v284_v45 }
  0xfa   :  { %v736_v51 = vpop.eup %735  ;;  %v392_v63 = vmul.f32 %v734_v46, %v883_v55  ;;  %vm463_vm13 = vcmp.eq.f32.partialorder %v896_v15, inf  ;;  %vm414_vm15 = vcmp.eq.f32.partialorder %v906_v24, inf  ;;  %vm416_vm0 = vcmp.eq.f32.partialorder %v906_v24, 0.0 }
  0xfb   :  { %v738_v54 = vpop.eup %737  ;;  %v927_v57 = vmax.f32 %v343_v47, 1e-07  ;;  %v344_v58 = vadd.f32 %v312_v49, %v311_v42  ;;  %v354_v1 = vadd.f32 %v332_v50, %v331_v43  ;;  %v947_v4 = vmul.f32 %v736_v51, %v885_v56 }
  0xfc   :  { %v740_v5 = vpop.eup %739  ;;  %v399_v6 = vmul.f32 %v738_v54, %v887_v61  ;;  %v394_v30 = vsel %vm393_vm5, %v883_v55, %v392_v63  ;;  %v976_v44 = vmax.f32 %v920_v48, 1e-07  ;;  %v417_v47 = vand.u32 2147483648, %v906_v24 }
  0xfd   :  { %749 = vrsqrt.f32 %v927_v57  ;;  %v942_v2 = vmax.f32 %v344_v58, 1e-07  ;;  %v238_v33 = vpop.f32.mrb[16].mxu0  ;;  %v288_v3 = vpop.f32.mrb[16].mxu1  ;;  %v980_v45 = vsel %vm395_vm7, %v396_v52, %v394_v30  ;;  %vm421_vm1 = vcmp.eq.f32.partialorder %v927_v57, inf }
  0xfe   :  { %751 = vrsqrt.f32 %v924_v53  ;;  %v313_v8 = vmul.f32 %v238_v33, %v238_v33  ;;  %v333_v9 = vmul.f32 %v288_v3, %v288_v3  ;;  %v240_v10 = vpop.f32.mrb[17].mxu0  ;;  %v290_v11 = vpop.f32.mrb[17].mxu1  ;;  %v401_v21 = vsel %vm400_vm6, %v887_v61, %v399_v6 }
  0xff   :  { %v742_v12 = vpop.eup %741  ;;  %753 = vrsqrt.f32 %v942_v2  ;;  %v314_v13 = vmul.f32 %v240_v10, %v240_v10  ;;  %v334_v14 = vmul.f32 %v290_v11, %v290_v11  ;;  %v242_v16 = vpop.f32.mrb[18].mxu0  ;;  %vm458_vm2 = vcmp.eq.f32.partialorder %v891_v7, 0.0 }
 0x100   :  { %v292_v17 = vpop.f32.mrb[18].mxu1  ;;  %v744_v20 = vpop.eup %743  ;;  %755 = vrsqrt.f32 %v939_v0  ;;  %v315_v22 = vmul.f32 %v242_v16, %v242_v16  ;;  %v406_v36 = vmul.f32 %v742_v12, %v900_v18  ;;  %v990_v48 = vmax.f32 %v354_v1, 1e-07 }
 0x101   :  { %v335_v23 = vmul.f32 %v292_v17, %v292_v17  ;;  %v244_v25 = vpop.f32.mrb[19].mxu0  ;;  %v294_v26 = vpop.f32.mrb[19].mxu1  ;;  %v345_v32 = vadd.f32 %v314_v13, %v313_v8  ;;  %v355_v34 = vadd.f32 %v334_v14, %v333_v9  ;;  %v994_v55 = vsel %vm402_vm8, %v403_v60, %v401_v21 }
 0x102   :  { %v746_v31 = vpop.eup %745  ;;  %v316_v35 = vmul.f32 %v244_v25, %v244_v25  ;;  %v336_v41 = vmul.f32 %v294_v26, %v294_v26  ;;  %v408_v49 = vsel %vm407_vm9, %v900_v18, %v406_v36  ;;  %vm423_vm3 = vcmp.eq.f32.partialorder %v927_v57, 0.0 }
 0x103   :  { %v971_v38 = vmax.f32 %v345_v32, 1e-07  ;;  %v413_v42 = vmul.f32 %v746_v31, %v906_v24  ;;  %v748_v43 = vpop.eup %747  ;;  %v424_v52 = vand.u32 2147483648, %v927_v57  ;;  %vm428_vm4 = vcmp.eq.f32.partialorder %v942_v2, inf }
 0x104   :  { %v346_v39 = vadd.f32 %v316_v35, %v315_v22  ;;  %v356_v40 = vadd.f32 %v336_v41, %v335_v23  ;;  %v1004_v58 = vmax.f32 %v355_v34, 1e-07  ;;  %vm430_vm5 = vcmp.eq.f32.partialorder %v942_v2, 0.0 }
 0x105   :  { %757 = vrsqrt.f32 %v971_v38  ;;  %v415_v51 = vsel %vm414_vm15, %v906_v24, %v413_v42  ;;  %v455_v60 = vmul.f32 %v740_v5, %v891_v7  ;;  %v462_v62 = vmul.f32 %v744_v20, %v896_v15 }
 0x106   :  { %v985_v46 = vmax.f32 %v346_v39, 1e-07  ;;  %v1010_v1 = vmax.f32 %v356_v40, 1e-07  ;;  %v1014_v33 = vsel %vm409_vm11, %v410_v37, %v408_v49  ;;  %v431_v3 = vand.u32 2147483648, %v942_v2 }
 0x107   :  { %v750_v50 = vpop.eup %749  ;;  %v450_v6 = vsel %vm449_vm10, %v885_v56, %v947_v4  ;;  %v1023_v5 = vsel %vm416_vm0, %v417_v47, %v415_v51  ;;  %vm435_vm6 = vcmp.eq.f32.partialorder %v971_v38, inf  ;;  %v438_v18 = vand.u32 2147483648, %v971_v38 }
 0x108   :  { %759 = vrsqrt.f32 %v985_v46  ;;  %v752_v54 = vpop.eup %751  ;;  %v420_v61 = vmul.f32 %v750_v50, %v927_v57  ;;  %v457_v11 = vsel %vm456_vm12, %v891_v7, %v455_v60  ;;  %v464_v24 = vsel %vm463_vm13, %v896_v15, %v462_v62 }
 0x109   :  { %v754_v63 = vpop.eup %753  ;;  %v469_v4 = vmul.f32 %v748_v43, %v912_v29  ;;  %vm437_vm7 = vcmp.eq.f32.partialorder %v971_v38, 0.0  ;;  %v445_v12 = vand.u32 2147483648, %v985_v46  ;;  %v453_v13 = vsel %vm451_vm14, %v452_v27, %v450_v6 }
 0x10a   :  { %v756_v8 = vpop.eup %755  ;;  %v427_v9 = vmul.f32 %v754_v63, %v942_v2  ;;  %v422_v10 = vsel %vm421_vm1, %v927_v57, %v420_v61  ;;  %v466_v14 = vand.u32 2147483648, %v896_v15  ;;  %v476_v16 = vmul.f32 %v752_v54, %v924_v53 }
 0x10b   :  { %vm465_vm8 = vcmp.eq.f32.partialorder %v896_v15, 0.0  ;;  %vm470_vm9 = vcmp.eq.f32.partialorder %v912_v29, inf  ;;  %vm472_vm10 = vcmp.eq.f32.partialorder %v912_v29, 0.0  ;;  %v483_v17 = vmul.f32 %v756_v8, %v939_v0 }
 0x10c   :  { %v1052_v20 = vsel %vm423_vm3, %v424_v52, %v422_v10  ;;  %v429_v27 = vsel %vm428_vm4, %v942_v2, %v427_v9  ;;  %vm442_vm11 = vcmp.eq.f32.partialorder %v985_v46, inf  ;;  %v460_v22 = vsel %vm458_vm2, %v459_v28, %v457_v11 }
 0x10d   :  { %v467_v23 = vsel %vm465_vm8, %v466_v14, %v464_v24  ;;  %v471_v26 = vsel %vm470_vm9, %v912_v29, %v469_v4  ;;  %vm477_vm12 = vcmp.eq.f32.partialorder %v924_v53, inf  ;;  %vm484_vm13 = vcmp.eq.f32.partialorder %v939_v0, inf }
 0x10e   :  { %761 = vrsqrt.f32 %v976_v44  ;;  %v473_v30 = vand.u32 2147483648, %v912_v29  ;;  %v478_v31 = vsel %vm477_vm12, %v924_v53, %v476_v16  ;;  %v485_v32 = vsel %vm484_vm13, %v939_v0, %v483_v17 }
 0x10f   :  { %v758_v25 = vpop.eup %757  ;;  %v1072_v28 = vsel %vm430_vm5, %v431_v3, %v429_v27  ;;  %vm444_vm14 = vcmp.eq.f32.partialorder %v985_v46, 0.0  ;;  %v480_v35 = vand.u32 2147483648, %v924_v53  ;;  %v487_v41 = vand.u32 2147483648, %v939_v0 }
 0x110   :  { %v434_v57 = vmul.f32 %v758_v25, %v971_v38  ;;  %763 = vrsqrt.f32 %v990_v48  ;;  %vm479_vm15 = vcmp.eq.f32.partialorder %v924_v53, 0.0  ;;  %vm486_vm0 = vcmp.eq.f32.partialorder %v939_v0, 0.0 }
 0x111   :  { %765 = vrsqrt.f32 %v1004_v58  ;;  %v474_v36 = vsel %vm472_vm10, %v473_v30, %v471_v26  ;;  %v481_v37 = vsel %vm479_vm15, %v480_v35, %v478_v31  ;;  %v488_v39 = vsel %vm486_vm0, %v487_v41, %v485_v32 }
 0x112   :  { %v760_v34 = vpop.eup %759  ;;  %v436_v21 = vsel %vm435_vm6, %v971_v38, %v434_v57  ;;  %vm491_vm1 = vcmp.eq.f32.partialorder %v976_v44, inf  ;;  %vm493_vm2 = vcmp.eq.f32.partialorder %v976_v44, 0.0  ;;  %v494_v40 = vand.u32 2147483648, %v976_v44 }
 0x113   :  { %v441_v2 = vmul.f32 %v760_v34, %v985_v46  ;;  %767 = vrsqrt.f32 %v1010_v1  ;;  %v1093_v42 = vsel %vm437_vm7, %v438_v18, %v436_v21  ;;  %vm498_vm3 = vcmp.eq.f32.partialorder %v990_v48, inf }
 0x114   :  { %v501_v43 = vand.u32 2147483648, %v990_v48  ;;  %v517_v47 = vsub.f32 %v453_v13, %v931_v59  ;;  %v518_v49 = vsub.f32 %v460_v22, %v956_v19  ;;  %vm500_vm4 = vcmp.eq.f32.partialorder %v990_v48, 0.0 }
 0x115   :  { %vm505_vm5 = vcmp.eq.f32.partialorder %v1004_v58, inf  ;;  %v519_v50 = vsub.f32 %v467_v23, %v980_v45  ;;  %v520_v51 = vsub.f32 %v474_v36, %v994_v55  ;;  %v521_v38 = vsub.f32 %v481_v37, %v1014_v33 }
 0x116   :  { %v522_v52 = vsub.f32 %v488_v39, %v1023_v5  ;;  %v443_v54 = vsel %vm442_vm11, %v985_v46, %v441_v2  ;;  %vm507_vm6 = vcmp.eq.f32.partialorder %v1004_v58, 0.0  ;;  %v527_v61 = vmul.f32 %v517_v47, %v517_v47 }
 0x117   :  { %v528_v60 = vmul.f32 %v518_v49, %v518_v49  ;;  %v555_v62 = vadd.f32 %v891_v7, %v885_v56  ;;  %v508_v63 = vand.u32 2147483648, %v1004_v58  ;;  %vm512_vm7 = vcmp.eq.f32.partialorder %v1010_v1, inf }
 0x118   :  { %v529_v3 = vmul.f32 %v519_v50, %v519_v50  ;;  %769 = vlog2.f32 %v453_v13  ;;  %v762_v6 = vpop.eup %761  ;;  %vm514_vm8 = vcmp.eq.f32.partialorder %v1010_v1, 0.0  ;;  %v530_v8 = vmul.f32 %v520_v51, %v520_v51 }
 0x119   :  { %v537_v9 = vadd.f32 %v528_v60, %v527_v61  ;;  %771 = vlog2.f32 %v460_v22  ;;  %v556_v18 = vadd.f32 %v555_v62, %v896_v15  ;;  %v1119_v10 = vsel %vm444_vm14, %v445_v12, %v443_v54 }
 0x11a   :  { %v490_v56 = vmul.f32 %v762_v6, %v976_v44  ;;  %v515_v7 = vand.u32 2147483648, %v1010_v1  ;;  %773 = vlog2.f32 %v467_v23  ;;  %v764_v11 = vpop.eup %763  ;;  %v531_v24 = vmul.f32 %v521_v38, %v521_v38 }
 0x11b   :  { %v538_v4 = vadd.f32 %v537_v9, %v529_v3  ;;  %775 = vlog2.f32 %v474_v36  ;;  %v557_v13 = vadd.f32 %v556_v18, %v912_v29  ;;  %v766_v14 = vpop.eup %765  ;;  %v497_v46 = vmul.f32 %v764_v11, %v990_v48 }
 0x11c   :  { %v492_v15 = vsel %vm491_vm1, %v976_v44, %v490_v56  ;;  %v532_v12 = vmul.f32 %v522_v52, %v522_v52  ;;  %777 = vlog2.f32 %v481_v37  ;;  %v504_v17 = vmul.f32 %v766_v14, %v1004_v58 }
 0x11d   :  { %v495_v16 = vsel %vm493_vm2, %v494_v40, %v492_v15  ;;  %v539_v27 = vadd.f32 %v538_v4, %v530_v8  ;;  %779 = vlog2.f32 %v488_v39  ;;  %v768_v22 = vpop.eup %767  ;;  %v499_v29 = vsel %vm498_vm3, %v990_v48, %v497_v46 }
 0x11e   :  { %v523_v23 = vsub.f32 %v495_v16, %v1052_v20  ;;  %781 = vlog2.f32 %v495_v16  ;;  %v558_v25 = vadd.f32 %v557_v13, %v924_v53  ;;  %v502_v26 = vsel %vm500_vm4, %v501_v43, %v499_v29 }
 0x11f   :  { %v506_v57 = vsel %vm505_vm5, %v1004_v58, %v504_v17  ;;  %v511_v30 = vmul.f32 %v768_v22, %v1010_v1  ;;  %v540_v31 = vadd.f32 %v539_v27, %v531_v24  ;;  %v524_v34 = vsub.f32 %v502_v26, %v1072_v28 }
 0x120   :  { %v509_v32 = vsel %vm507_vm6, %v508_v63, %v506_v57  ;;  %v533_v35 = vmul.f32 %v523_v23, %v523_v23  ;;  %783 = vlog2.f32 %v502_v26  ;;  %v559_v39 = vadd.f32 %v558_v25, %v939_v0 }
 0x121   :  { %v513_v53 = vsel %vm512_vm7, %v1010_v1, %v511_v30  ;;  %v525_v41 = vsub.f32 %v509_v32, %v1093_v42  ;;  %v541_v21 = vadd.f32 %v540_v31, %v532_v12  ;;  %785 = vlog2.f32 %v509_v32 }
 0x122   :  { %v770_v2 = vpop.eup %769  ;;  %v516_v36 = vsel %vm514_vm8, %v515_v7, %v513_v53  ;;  %v534_v37 = vmul.f32 %v524_v34, %v524_v34  ;;  %787 = vlog2.f32 %v931_v59  ;;  %v560_v51 = vadd.f32 %v559_v39, %v976_v44 }
 0x123   :  { %v772_v40 = vpop.eup %771  ;;  %v526_v43 = vsub.f32 %v516_v36, %v1119_v10  ;;  %v535_v47 = vmul.f32 %v525_v41, %v525_v41  ;;  %v542_v49 = vadd.f32 %v541_v21, %v533_v35  ;;  %789 = vlog2.f32 %v516_v36 }
 0x124   :  { %v774_v50 = vpop.eup %773  ;;  %791 = vlog2.f32 %v956_v19  ;;  %v561_v59 = vadd.f32 %v560_v51, %v990_v48  ;;  %v574_v48 = vmul.f32 0.6931472, %v770_v2 }
 0x125   :  { %v776_v38 = vpop.eup %775  ;;  %v536_v52 = vmul.f32 %v526_v43, %v526_v43  ;;  %v543_v54 = vadd.f32 %v542_v49, %v534_v37  ;;  %793 = vlog2.f32 %v980_v45  ;;  %v578_v8 = vmul.f32 0.6931472, %v774_v50 }
 0x126   :  { %v778_v61 = vpop.eup %777  ;;  %795 = vlog2.f32 %v994_v55  ;;  %v562_v19 = vadd.f32 %v561_v59, %v1004_v58 }
 0x127   :  { %v780_v0 = vpop.eup %779  ;;  %v544_v60 = vadd.f32 %v543_v54, %v535_v47  ;;  %797 = vlog2.f32 %v1014_v33 }
 0x128   :  { %v782_v62 = vpop.eup %781  ;;  %799 = vlog2.f32 %v1023_v5  ;;  %v563_v45 = vadd.f32 %v562_v19, %v1010_v1  ;;  %v576_v5 = vmul.f32 0.6931472, %v772_v40  ;;  %v582_v1 = vmul.f32 0.6931472, %v778_v61 }
 0x129   :  { %v545_v44 = vadd.f32 %v544_v60, %v536_v52  ;;  %801 = vlog2.f32 %v1052_v20  ;;  %v580_v20 = vmul.f32 0.6931472, %v776_v38  ;;  %v586_v24 = vmul.f32 0.6931472, %v782_v62 }
 0x12a   :  { %v784_v63 = vpop.eup %783  ;;  %803 = vlog2.f32 %v1072_v28 }
 0x12b   :  { %v786_v55 = vpop.eup %785  ;;  %805 = vlog2.f32 %v1093_v42  ;;  %546 = vadd.xlane.f32.xlu0 %v545_v44  ;;  %v584_v42 = vmul.f32 0.6931472, %v780_v0 }
 0x12c   :  { %v788_v3 = vpop.eup %787  ;;  %807 = vlog2.f32 %v1119_v10  ;;  %v588_v10 = vmul.f32 0.6931472, %v784_v63  ;;  %v590_v15 = vmul.f32 0.6931472, %v786_v55 }
 0x12d   :  { %v790_v33 = vpop.eup %789  ;;  %v594_v6 = vmul.f32 0.6931472, %v788_v3 }
 0x12e   :  { %v792_v58 = vpop.eup %791  ;;  %v592_v25 = vmul.f32 0.6931472, %v790_v33 }
 0x12f   :  { %v794_v9 = vpop.eup %793  ;;  %564 = vadd.xlane.f32.xlu0 %v563_v45  ;;  %v596_v18 = vmul.f32 0.6931472, %v792_v58  ;;  %v613_v28 = vsub.f32 %v574_v48, %v594_v6 }
 0x130   :  { %v796_v56 = vpop.eup %795  ;;  %v598_v7 = vmul.f32 0.6931472, %v794_v9 }
 0x131   :  { %v798_v11 = vpop.eup %797  ;;  %v600_v4 = vmul.f32 0.6931472, %v796_v56  ;;  %v614_v13 = vsub.f32 %v576_v5, %v596_v18  ;;  %v623_v22 = vand.u32 2147483647, %v613_v28 }
 0x132   :  { %v800_v14 = vpop.eup %799  ;;  %v602_v46 = vmul.f32 0.6931472, %v798_v11  ;;  %v615_v12 = vsub.f32 %v578_v8, %v598_v7 }
 0x133   :  { %v802_v16 = vpop.eup %801  ;;  %v604_v17 = vmul.f32 0.6931472, %v800_v14  ;;  %v616_v27 = vsub.f32 %v580_v20, %v600_v4  ;;  %v624_v29 = vand.u32 2147483647, %v614_v13  ;;  %v651_v4 = vlaneseq }
 0x134   :  { %v804_v23 = vpop.eup %803  ;;  %v606_v26 = vmul.f32 0.6931472, %v802_v16  ;;  %v617_v57 = vsub.f32 %v582_v1, %v602_v46  ;;  %v625_v30 = vand.u32 2147483647, %v615_v12 }
 0x135   :  { %v806_v31 = vpop.eup %805  ;;  %v608_v32 = vmul.f32 0.6931472, %v804_v23  ;;  %v618_v34 = vsub.f32 %v584_v42, %v604_v17  ;;  %v626_v35 = vand.u32 2147483647, %v616_v27  ;;  %v633_v53 = vadd.f32 %v624_v29, %v623_v22 }
 0x136   :  { %v808_v41 = vpop.eup %807  ;;  %v610_v21 = vmul.f32 0.6931472, %v806_v31  ;;  %v619_v2 = vsub.f32 %v586_v24, %v606_v26  ;;  %v627_v39 = vand.u32 2147483647, %v617_v57  ;;  %v652_v13 = vand.u32 127, %v651_v4 }
 0x137   :  { %v612_v36 = vmul.f32 0.6931472, %v808_v41  ;;  %v620_v37 = vsub.f32 %v588_v10, %v608_v32  ;;  %v634_v40 = vadd.f32 %v633_v53, %v625_v30  ;;  %v628_v49 = vand.u32 2147483647, %v618_v34 }
 0x138   :  { %v621_v43 = vsub.f32 %v590_v15, %v610_v21  ;;  %v629_v51 = vand.u32 2147483647, %v619_v2  ;;  %vm657_vm9 = vcmp.eq.s32.totalorder %v652_v13, 1  ;;  %vm654_vm10 = vcmp.eq.s32.totalorder %v652_v13, 0 }
 0x139   :  { %v622_v47 = vsub.f32 %v592_v25, %v612_v36  ;;  %v635_v50 = vadd.f32 %v634_v40, %v626_v35  ;;  %v630_v52 = vand.u32 2147483647, %v620_v37  ;;  %vm661_vm11 = vcmp.eq.s32.totalorder %v652_v13, 2 }
 0x13a   :  { %v631_v61 = vand.u32 2147483647, %v621_v43 }
 0x13b   :  { %v636_v38 = vadd.f32 %v635_v50, %v627_v39  ;;  %v632_v0 = vand.u32 2147483647, %v622_v47 }
 0x13d   :  { %v637_v54 = vadd.f32 %v636_v38, %v628_v49 }
 0x13f   :  { %v638_v59 = vadd.f32 %v637_v54, %v629_v51 }
 0x141   :  { %v639_v60 = vadd.f32 %v638_v59, %v630_v52 }
 0x143   :  { %v640_v62 = vadd.f32 %v639_v60, %v631_v61 }
 0x145   :  { %v641_v19 = vadd.f32 %v640_v62, %v632_v0 }
 0x147   :  { %642 = vadd.xlane.f32.xlu1 %v641_v19 }
 0x1b8   :  { %v547_v44 = vpop.xlane.xlu0 %546 }
 0x1b9   :  { %v548_v63 = vrot.slane %v547_v44, 4 }
 0x1bb   :  { %v549_v45 = vadd.f32 %v548_v63, %v547_v44 }
 0x1bc   :  { %v565_v55 = vpop.xlane.xlu0 %564 }
 0x1bd   :  { %v550_v48 = vrot.slane %v549_v45, 2  ;;  %v566_v3 = vrot.slane %v565_v55, 4 }
 0x1bf   :  { %v567_v33 = vadd.f32 %v566_v3, %v565_v55  ;;  %v551_v5 = vadd.f32 %v550_v48, %v549_v45 }
 0x1c1   :  { %v568_v6 = vrot.slane %v567_v33, 2  ;;  %v552_v58 = vrot.slane %v551_v5, 1 }
 0x1c3   :  { %v569_v8 = vadd.f32 %v568_v6, %v567_v33  ;;  %v553_v9 = vadd.f32 %v552_v58, %v551_v5 }
 0x1c5   :  { %705 = vpush %v553_v9  ;;  %v570_v20 = vrot.slane %v569_v8, 1 }
 0x1c7   :  { %v571_v18 = vadd.f32 %v570_v20, %v569_v8 }
 0x1c9   :  { %707 = vpush %v571_v18 }
 0x1d4   :  { %v643_v28 = vpop.xlane.xlu1 %642 }
 0x1d5   :  { %v644_v56 = vrot.slane %v643_v28, 4 }
 0x1d7   :  { %v645_v1 = vadd.f32 %v644_v56, %v643_v28 }
 0x1d9   :  { %v646_v7 = vrot.slane %v645_v1, 2 }
 0x1db   :  { %v647_v11 = vadd.f32 %v646_v7, %v645_v1 }
 0x1dd   :  { %v648_v42 = vrot.slane %v647_v11, 1 }
 0x1df   :  { %v649_v24 = vadd.f32 %v648_v42, %v647_v11 }
 0x1e1   :  { %709 = vpush %v649_v24 }
 0x1f6   :  { %s706_s0 = spop %705 }
 0x1f7   :  { %v655_v10 = vstv %s706_s0 }
 0x1f8   :  { %v656_v46 = vsel %vm654_vm10, %v655_v10, 0.0 }
 0x1fa   :  { %s708_s8 = spop %707 }
 0x1fb   :  { %v658_v14 = vstv %s708_s8 }
 0x1fc   :  { %v659_v15 = vsel %vm657_vm9, %v658_v14, 0.0 }
 0x1fd   :  { %v660_v12 = vadd.f32 %v659_v15, %v656_v46 }
 0x212   :  { %s710_s9 = spop %709 }
 0x213   :  { %v662_v16 = vstv %s710_s9 }
 0x214   :  { %v663_v17 = vsel %vm661_vm11, %v662_v16, 0.0 }
 0x215   :  { %v664_v27 = vadd.f32 %v663_v17, %v660_v12 }
 0x217   :  { %666 = vst [vmem:[%s1172_s2] sm:$0xff] %v664_v27 }

</bundles_post_ra>
